<compile_context>
chip_gen: v7x
topology: tpu7x:2x2x1
jax: 0.10.0
libtpu: 0.0.40
codegen_flags: <defaults>
</compile_context>

<pallas_src>
import jax
import jax.numpy as jnp
from jax import lax
from jax.experimental import pallas as pl
from jax.experimental.pallas import tpu as pltpu

# ------------------------- model hyperparams (small) -------------------------
FEAT_SIZE = 32      # vocab size for the embedding
EMBED_SIZE = 64
HIDDEN_SIZE = 64
HIDDEN_PAD = 128    # each gate padded to a full 128-lane tile
N_LAYERS = 1
BATCH = 2
SEQ = 8

GATE_PERM = (0, 1, 3, 2)   # torch [i, f, g, o] -> kernel [i, f, o, g]


# ------------------------------ Pallas kernel --------------------------------
def lstm_kernel(ids_ref, emb_ref, whh_ref, h0_ref, c0_ref, fcw_ref, fcb_ref,
                out_ref, hT_ref, cT_ref):
    """Full-sequence LSTM with in-kernel embedding gather, single call.

    ids_ref: (B*T,)      int32 token ids in SMEM, batch-major (b*T + t)
    emb_ref: (V, 4*HP)   pre-projected per-token gates: emb @ W_ih + (b_ih+b_hh),
                         gate order [i,f,o,g], pad lanes zero (VMEM)
    whh_ref: (HP, 4*HP)  hidden->gates weight, bf16, zero rows >= H / pad cols zero
    h0/c0:   (NL, B, HP) initial state, pad lanes zero
    fcw_ref: (1, HP)     final linear weight (pad lanes zero)
    fcb_ref: (1, 1)      final linear bias
    out_ref: (B, 1)      sigmoid(fc(h_T))
    hT/cT:   (NL, B, HP) final hidden/cell state (padded, pad lanes stay zero)
    """
    B = h0_ref.shape[1]
    HP = h0_ref.shape[2]
    T = ids_ref.shape[0] // B

    def step(t, carry):
        h, c = carry
        # In-kernel gather of the pre-projected token rows (ids are SMEM scalars).
        x_rows = [emb_ref[pl.ds(ids_ref[b * T + t], 1), :] for b in range(B)]
        xp = jnp.concatenate(x_rows, axis=0)                       # (B, 4*HP)

        # Single MXU matmul per step, bf16 operands, f32 accumulation.
        gates = xp + jnp.dot(h.astype(whh_ref.dtype), whh_ref[...],
                             preferred_element_type=jnp.float32)   # (B, 4*HP) f32

        # Gate order [i, f, o, g]: sigmoid over 3 lane tiles, tanh over 1.
        sig = jax.nn.sigmoid(gates[:, : 3 * HP])
        g_g = jnp.tanh(gates[:, 3 * HP:])
        i_g = sig[:, 0 * HP:1 * HP]
        f_g = sig[:, 1 * HP:2 * HP]
        o_g = sig[:, 2 * HP:3 * HP]

        c_new = f_g * c + i_g * g_g
        h_new = o_g * jnp.tanh(c_new)
        return (h_new, c_new)

    # T is static (=8): fully unroll so the scheduler overlaps EUP/MXU across steps.
    h, c = lax.fori_loop(0, T, step, (h0_ref[0], c0_ref[0]), unroll=True)

    hT_ref[0] = h
    cT_ref[0] = c

    # TODO(synk): nn.Dropout(0.5) is identity at inference; training-mode mask not applied.
    # fc + sigmoid on the last timestep (== fc over all steps then [:, -1] in torch code).
    # Lane-axis reduction instead of an MXU pass; fc_w pad lanes are zero.
    logits = jnp.sum(h * fcw_ref[...], axis=-1, keepdims=True) + fcb_ref[...]   # (B, 1)
    out_ref[...] = jax.nn.sigmoid(logits)


# ------------------------------- forward pass --------------------------------
@jax.jit
def lstm_forward(x_ids, packed, hidden):
    """Mirrors LSTMModel.forward: returns (sigmoid_last, (h, c)).

    hidden is kept 128-lane padded (N_LAYERS, B, HIDDEN_PAD) across calls; the
    torch-equivalent state is hidden[..., :HIDDEN_SIZE] (pad lanes stay exactly 0).
    """
    B = x_ids.shape[0]
    h0_p, c0_p = hidden                              # each (N_LAYERS, B, HP), padded
    ids_flat = x_ids.reshape(-1).astype(jnp.int32)   # (B*T,), batch-major

    vmem = pl.BlockSpec(memory_space=pltpu.MemorySpace.VMEM)
    smem = pl.BlockSpec(memory_space=pltpu.MemorySpace.SMEM)

    # No grid: at B=2 the whole problem is one launch; the second v7x TensorCore
    # would only pay off with a batch grid axis at much larger B.
    out, hT, cT = pl.pallas_call(
        lstm_kernel,
        out_shape=(
            jax.ShapeDtypeStruct((B, 1), jnp.float32),
            jax.ShapeDtypeStruct((N_LAYERS, B, HIDDEN_PAD), jnp.float32),
            jax.ShapeDtypeStruct((N_LAYERS, B, HIDDEN_PAD), jnp.float32),
        ),
        in_specs=[smem, vmem, vmem, vmem, vmem, vmem, vmem],
        out_specs=(vmem, vmem, vmem),
    )(ids_flat, packed["emb_proj"], packed["w_hh"], h0_p, c0_p,
      packed["fc_w"], packed["fc_b"])

    sigmoid_last = out[:, 0]                         # (B,)
    return sigmoid_last, (hT, cT)


# --------------------------- deterministic params ----------------------------
def init_params(key):
    """Raw torch-equivalent parameters."""
    k_emb, k_wih, k_whh, k_bih, k_bhh, k_fcw, k_fcb = jax.random.split(key, 7)
    H, E, V = HIDDEN_SIZE, EMBED_SIZE, FEAT_SIZE
    k = 1.0 / jnp.sqrt(jnp.float32(H))
    return {
        # nn.Embedding default init: N(0, 1)
        "embedding": jax.random.normal(k_emb, (V, E), jnp.float32),
        # nn.LSTM weights U(-k, k); stored transposed, gate order [i, f, g, o]
        "w_ih": jax.random.uniform(k_wih, (E, 4 * H), jnp.float32, -k, k),
        "w_hh": jax.random.uniform(k_whh, (H, 4 * H), jnp.float32, -k, k),
        "b_gates": (jax.random.uniform(k_bih, (1, 4 * H), jnp.float32, -k, k)
                    + jax.random.uniform(k_bhh, (1, 4 * H), jnp.float32, -k, k)),
        # nn.Linear(H, 1): U(-1/sqrt(H), 1/sqrt(H)); stored transposed (H, 1)
        "fc_w": jax.random.uniform(k_fcw, (H, 1), jnp.float32, -k, k),
        "fc_b": jax.random.uniform(k_fcb, (1, 1), jnp.float32, -k, k),
    }


def pack_params(raw):
    """Fold W_ih + bias into the embedding table, reorder gates to [i,f,o,g],
    pad each gate to 128 lanes, and store W_hh in bf16 for the MXU."""
    H, HP, V = HIDDEN_SIZE, HIDDEN_PAD, FEAT_SIZE

    # emb_proj[v] = embedding[v] @ W_ih + (b_ih + b_hh), gates permuted then padded.
    proj = raw["embedding"] @ raw["w_ih"] + raw["b_gates"]            # (V, 4H)
    proj = proj.reshape(V, 4, H)[:, GATE_PERM, :]                     # [i,f,o,g]
    emb_proj = (jnp.zeros((V, 4, HP), jnp.float32)
                .at[:, :, :H].set(proj)
                .reshape(V, 4 * HP))

    # W_hh: (H, 4H) -> permute gates -> (HP, 4*HP) zero-padded -> bf16 (MXU operand only).
    whh = raw["w_hh"].reshape(H, 4, H)[:, GATE_PERM, :]
    whh_p = (jnp.zeros((HP, 4, HP), jnp.float32)
             .at[:H, :, :H].set(whh)
             .reshape(HP, 4 * HP)
             .astype(jnp.bfloat16))

    # fc weight: (H, 1) -> (1, HP) with zero pad lanes (lane reduction gives fc(h)).
    fcw_p = jnp.zeros((1, HP), jnp.float32).at[0, :H].set(raw["fc_w"][:, 0])

    return {"emb_proj": emb_proj, "w_hh": whh_p, "fc_w": fcw_p, "fc_b": raw["fc_b"]}


def init_hidden(batch):
    # TODO(synk): only n_layers == 1 is supported (layer 0 state used).
    # State is kept 128-lane padded across calls; torch state == [..., :HIDDEN_SIZE].
    h = jnp.zeros((N_LAYERS, batch, HIDDEN_PAD), jnp.float32)
    c = jnp.zeros((N_LAYERS, batch, HIDDEN_PAD), jnp.float32)
    return (h, c)


# ----------------------------------- main -------------------------------------
if __name__ == "__main__":
    key = jax.random.PRNGKey(0)
    k_params, k_x = jax.random.split(key)

    raw_params = init_params(k_params)
    packed = pack_params(raw_params)

    x = jax.random.randint(k_x, (BATCH, SEQ), 0, FEAT_SIZE, dtype=jnp.int32)
    hidden = init_hidden(BATCH)

    sigmoid_last, (h_out, c_out) = lstm_forward(x, packed, hidden)
    jax.block_until_ready((sigmoid_last, h_out, c_out))

    assert sigmoid_last.shape == (BATCH,)
    assert h_out.shape == (N_LAYERS, BATCH, HIDDEN_PAD)
    assert c_out.shape == (N_LAYERS, BATCH, HIDDEN_PAD)
    # Pad-lane-zero invariant: padded state can be fed straight back into the next call.
    assert bool(jnp.all(h_out[..., HIDDEN_SIZE:] == 0.0))
    assert bool(jnp.all(c_out[..., HIDDEN_SIZE:] == 0.0))
    assert bool(jnp.all(jnp.isfinite(sigmoid_last)))
    print("KERNEL_OK")
</pallas_src>

<mosaic_0001>
module attributes {stable_mosaic.version = 11 : i64} {
  func.func @lstm_kernel(%arg0: memref<16xi32, #tpu.memory_space<smem>>, %arg1: memref<32x512xf32, #tpu.memory_space<vmem>>, %arg2: memref<128x512xbf16, #tpu.memory_space<vmem>>, %arg3: memref<1x2x128xf32, #tpu.memory_space<vmem>>, %arg4: memref<1x2x128xf32, #tpu.memory_space<vmem>>, %arg5: memref<1x128xf32, #tpu.memory_space<vmem>>, %arg6: memref<1x1xf32, #tpu.memory_space<vmem>>, %arg7: memref<2x1xf32, #tpu.memory_space<vmem>>, %arg8: memref<1x2x128xf32, #tpu.memory_space<vmem>>, %arg9: memref<1x2x128xf32, #tpu.memory_space<vmem>>) attributes {dimension_semantics = [], scalar_prefetch = 0 : i64, scratch_operands = 0 : i64, tpu.core_type = #tpu.core_type<tc>} {
    %c0 = arith.constant 0 : index
    %c0_0 = arith.constant 0 : index
    %c0_1 = arith.constant 0 : index
    %0 = vector.load %arg3[%c0, %c0_0, %c0_1] : memref<1x2x128xf32, #tpu.memory_space<vmem>>, vector<1x2x128xf32>
    %1 = vector.shape_cast %0 : vector<1x2x128xf32> to vector<2x128xf32>
    %c0_2 = arith.constant 0 : index
    %c0_3 = arith.constant 0 : index
    %c0_4 = arith.constant 0 : index
    %2 = vector.load %arg4[%c0_2, %c0_3, %c0_4] : memref<1x2x128xf32, #tpu.memory_space<vmem>>, vector<1x2x128xf32>
    %3 = vector.shape_cast %2 : vector<1x2x128xf32> to vector<2x128xf32>
    %c0_i32 = arith.constant 0 : i32
    %c0_i32_5 = arith.constant 0 : i32
    %4 = arith.addi %c0_i32_5, %c0_i32 : i32
    %5 = arith.index_cast %4 : i32 to index
    %6 = memref.load %arg0[%5] : memref<16xi32, #tpu.memory_space<smem>>
    %7 = arith.index_cast %6 : i32 to index
    %c0_6 = arith.constant 0 : index
    %8 = vector.load %arg1[%7, %c0_6] : memref<32x512xf32, #tpu.memory_space<vmem>>, vector<1x512xf32>
    %c8_i32 = arith.constant 8 : i32
    %9 = arith.addi %c8_i32, %c0_i32 : i32
    %10 = arith.index_cast %9 : i32 to index
    %11 = memref.load %arg0[%10] : memref<16xi32, #tpu.memory_space<smem>>
    %12 = arith.index_cast %11 : i32 to index
    %c0_7 = arith.constant 0 : index
    %13 = vector.load %arg1[%12, %c0_7] : memref<32x512xf32, #tpu.memory_space<vmem>>, vector<1x512xf32>
    %14 = tpu.concatenate %8, %13 in 0 : vector<1x512xf32>, vector<1x512xf32> -> vector<2x512xf32>
    %15 = arith.truncf %1 : vector<2x128xf32> to vector<2x128xbf16>
    %c0_8 = arith.constant 0 : index
    %c0_9 = arith.constant 0 : index
    %16 = vector.load %arg2[%c0_8, %c0_9] : memref<128x512xbf16, #tpu.memory_space<vmem>>, vector<128x512xbf16>
    %cst = arith.constant dense<0.000000e+00> : vector<2x512xf32>
    %17 = tpu.matmul %15, %16, %cst {dimension_numbers = #tpu.dot_dimension_numbers<[1], [0], [0], [1], [0, 0, 1, 1], [], []>} : vector<2x128xbf16>, vector<128x512xbf16>, vector<2x512xf32> -> vector<2x512xf32>
    %18 = arith.addf %14, %17 : vector<2x512xf32>
    %19 = vector.extract_strided_slice %18 {offsets = [0, 0], sizes = [2, 384], strides = [1, 1]} : vector<2x512xf32> to vector<2x384xf32>
    %20 = arith.negf %19 : vector<2x384xf32>
    %21 = math.exp %20 : vector<2x384xf32>
    %cst_10 = arith.constant 1.000000e+00 : f32
    %22 = vector.broadcast %cst_10 : f32 to vector<2x384xf32>
    %23 = arith.addf %22, %21 : vector<2x384xf32>
    %24 = arith.divf %22, %23 : vector<2x384xf32>
    %25 = vector.extract_strided_slice %18 {offsets = [0, 384], sizes = [2, 128], strides = [1, 1]} : vector<2x512xf32> to vector<2x128xf32>
    %26 = math.tanh %25 : vector<2x128xf32>
    %27 = vector.extract_strided_slice %24 {offsets = [0, 0], sizes = [2, 128], strides = [1, 1]} : vector<2x384xf32> to vector<2x128xf32>
    %28 = vector.extract_strided_slice %24 {offsets = [0, 128], sizes = [2, 128], strides = [1, 1]} : vector<2x384xf32> to vector<2x128xf32>
    %29 = vector.extract_strided_slice %24 {offsets = [0, 256], sizes = [2, 128], strides = [1, 1]} : vector<2x384xf32> to vector<2x128xf32>
    %30 = arith.mulf %28, %3 : vector<2x128xf32>
    %31 = arith.mulf %27, %26 : vector<2x128xf32>
    %32 = arith.addf %30, %31 : vector<2x128xf32>
    %33 = math.tanh %32 : vector<2x128xf32>
    %34 = arith.mulf %29, %33 : vector<2x128xf32>
    %c1_i32 = arith.constant 1 : i32
    %c0_i32_11 = arith.constant 0 : i32
    %35 = arith.addi %c0_i32_11, %c1_i32 : i32
    %36 = arith.index_cast %35 : i32 to index
    %37 = memref.load %arg0[%36] : memref<16xi32, #tpu.memory_space<smem>>
    %38 = arith.index_cast %37 : i32 to index
    %c0_12 = arith.constant 0 : index
    %39 = vector.load %arg1[%38, %c0_12] : memref<32x512xf32, #tpu.memory_space<vmem>>, vector<1x512xf32>
    %c8_i32_13 = arith.constant 8 : i32
    %40 = arith.addi %c8_i32_13, %c1_i32 : i32
    %41 = arith.index_cast %40 : i32 to index
    %42 = memref.load %arg0[%41] : memref<16xi32, #tpu.memory_space<smem>>
    %43 = arith.index_cast %42 : i32 to index
    %c0_14 = arith.constant 0 : index
    %44 = vector.load %arg1[%43, %c0_14] : memref<32x512xf32, #tpu.memory_space<vmem>>, vector<1x512xf32>
    %45 = tpu.concatenate %39, %44 in 0 : vector<1x512xf32>, vector<1x512xf32> -> vector<2x512xf32>
    %46 = arith.truncf %34 : vector<2x128xf32> to vector<2x128xbf16>
    %c0_15 = arith.constant 0 : index
    %c0_16 = arith.constant 0 : index
    %47 = vector.load %arg2[%c0_15, %c0_16] : memref<128x512xbf16, #tpu.memory_space<vmem>>, vector<128x512xbf16>
    %cst_17 = arith.constant dense<0.000000e+00> : vector<2x512xf32>
    %48 = tpu.matmul %46, %47, %cst_17 {dimension_numbers = #tpu.dot_dimension_numbers<[1], [0], [0], [1], [0, 0, 1, 1], [], []>} : vector<2x128xbf16>, vector<128x512xbf16>, vector<2x512xf32> -> vector<2x512xf32>
    %49 = arith.addf %45, %48 : vector<2x512xf32>
    %50 = vector.extract_strided_slice %49 {offsets = [0, 0], sizes = [2, 384], strides = [1, 1]} : vector<2x512xf32> to vector<2x384xf32>
    %51 = arith.negf %50 : vector<2x384xf32>
    %52 = math.exp %51 : vector<2x384xf32>
    %cst_18 = arith.constant 1.000000e+00 : f32
    %53 = vector.broadcast %cst_18 : f32 to vector<2x384xf32>
    %54 = arith.addf %53, %52 : vector<2x384xf32>
    %55 = arith.divf %53, %54 : vector<2x384xf32>
    %56 = vector.extract_strided_slice %49 {offsets = [0, 384], sizes = [2, 128], strides = [1, 1]} : vector<2x512xf32> to vector<2x128xf32>
    %57 = math.tanh %56 : vector<2x128xf32>
    %58 = vector.extract_strided_slice %55 {offsets = [0, 0], sizes = [2, 128], strides = [1, 1]} : vector<2x384xf32> to vector<2x128xf32>
    %59 = vector.extract_strided_slice %55 {offsets = [0, 128], sizes = [2, 128], strides = [1, 1]} : vector<2x384xf32> to vector<2x128xf32>
    %60 = vector.extract_strided_slice %55 {offsets = [0, 256], sizes = [2, 128], strides = [1, 1]} : vector<2x384xf32> to vector<2x128xf32>
    %61 = arith.mulf %59, %32 : vector<2x128xf32>
    %62 = arith.mulf %58, %57 : vector<2x128xf32>
    %63 = arith.addf %61, %62 : vector<2x128xf32>
    %64 = math.tanh %63 : vector<2x128xf32>
    %65 = arith.mulf %60, %64 : vector<2x128xf32>
    %c2_i32 = arith.constant 2 : i32
    %c0_i32_19 = arith.constant 0 : i32
    %66 = arith.addi %c0_i32_19, %c2_i32 : i32
    %67 = arith.index_cast %66 : i32 to index
    %68 = memref.load %arg0[%67] : memref<16xi32, #tpu.memory_space<smem>>
    %69 = arith.index_cast %68 : i32 to index
    %c0_20 = arith.constant 0 : index
    %70 = vector.load %arg1[%69, %c0_20] : memref<32x512xf32, #tpu.memory_space<vmem>>, vector<1x512xf32>
    %c8_i32_21 = arith.constant 8 : i32
    %71 = arith.addi %c8_i32_21, %c2_i32 : i32
    %72 = arith.index_cast %71 : i32 to index
    %73 = memref.load %arg0[%72] : memref<16xi32, #tpu.memory_space<smem>>
    %74 = arith.index_cast %73 : i32 to index
    %c0_22 = arith.constant 0 : index
    %75 = vector.load %arg1[%74, %c0_22] : memref<32x512xf32, #tpu.memory_space<vmem>>, vector<1x512xf32>
    %76 = tpu.concatenate %70, %75 in 0 : vector<1x512xf32>, vector<1x512xf32> -> vector<2x512xf32>
    %77 = arith.truncf %65 : vector<2x128xf32> to vector<2x128xbf16>
    %c0_23 = arith.constant 0 : index
    %c0_24 = arith.constant 0 : index
    %78 = vector.load %arg2[%c0_23, %c0_24] : memref<128x512xbf16, #tpu.memory_space<vmem>>, vector<128x512xbf16>
    %cst_25 = arith.constant dense<0.000000e+00> : vector<2x512xf32>
    %79 = tpu.matmul %77, %78, %cst_25 {dimension_numbers = #tpu.dot_dimension_numbers<[1], [0], [0], [1], [0, 0, 1, 1], [], []>} : vector<2x128xbf16>, vector<128x512xbf16>, vector<2x512xf32> -> vector<2x512xf32>
    %80 = arith.addf %76, %79 : vector<2x512xf32>
    %81 = vector.extract_strided_slice %80 {offsets = [0, 0], sizes = [2, 384], strides = [1, 1]} : vector<2x512xf32> to vector<2x384xf32>
    %82 = arith.negf %81 : vector<2x384xf32>
    %83 = math.exp %82 : vector<2x384xf32>
    %cst_26 = arith.constant 1.000000e+00 : f32
    %84 = vector.broadcast %cst_26 : f32 to vector<2x384xf32>
    %85 = arith.addf %84, %83 : vector<2x384xf32>
    %86 = arith.divf %84, %85 : vector<2x384xf32>
    %87 = vector.extract_strided_slice %80 {offsets = [0, 384], sizes = [2, 128], strides = [1, 1]} : vector<2x512xf32> to vector<2x128xf32>
    %88 = math.tanh %87 : vector<2x128xf32>
    %89 = vector.extract_strided_slice %86 {offsets = [0, 0], sizes = [2, 128], strides = [1, 1]} : vector<2x384xf32> to vector<2x128xf32>
    %90 = vector.extract_strided_slice %86 {offsets = [0, 128], sizes = [2, 128], strides = [1, 1]} : vector<2x384xf32> to vector<2x128xf32>
    %91 = vector.extract_strided_slice %86 {offsets = [0, 256], sizes = [2, 128], strides = [1, 1]} : vector<2x384xf32> to vector<2x128xf32>
    %92 = arith.mulf %90, %63 : vector<2x128xf32>
    %93 = arith.mulf %89, %88 : vector<2x128xf32>
    %94 = arith.addf %92, %93 : vector<2x128xf32>
    %95 = math.tanh %94 : vector<2x128xf32>
    %96 = arith.mulf %91, %95 : vector<2x128xf32>
    %c3_i32 = arith.constant 3 : i32
    %c0_i32_27 = arith.constant 0 : i32
    %97 = arith.addi %c0_i32_27, %c3_i32 : i32
    %98 = arith.index_cast %97 : i32 to index
    %99 = memref.load %arg0[%98] : memref<16xi32, #tpu.memory_space<smem>>
    %100 = arith.index_cast %99 : i32 to index
    %c0_28 = arith.constant 0 : index
    %101 = vector.load %arg1[%100, %c0_28] : memref<32x512xf32, #tpu.memory_space<vmem>>, vector<1x512xf32>
    %c8_i32_29 = arith.constant 8 : i32
    %102 = arith.addi %c8_i32_29, %c3_i32 : i32
    %103 = arith.index_cast %102 : i32 to index
    %104 = memref.load %arg0[%103] : memref<16xi32, #tpu.memory_space<smem>>
    %105 = arith.index_cast %104 : i32 to index
    %c0_30 = arith.constant 0 : index
    %106 = vector.load %arg1[%105, %c0_30] : memref<32x512xf32, #tpu.memory_space<vmem>>, vector<1x512xf32>
    %107 = tpu.concatenate %101, %106 in 0 : vector<1x512xf32>, vector<1x512xf32> -> vector<2x512xf32>
    %108 = arith.truncf %96 : vector<2x128xf32> to vector<2x128xbf16>
    %c0_31 = arith.constant 0 : index
    %c0_32 = arith.constant 0 : index
    %109 = vector.load %arg2[%c0_31, %c0_32] : memref<128x512xbf16, #tpu.memory_space<vmem>>, vector<128x512xbf16>
    %cst_33 = arith.constant dense<0.000000e+00> : vector<2x512xf32>
    %110 = tpu.matmul %108, %109, %cst_33 {dimension_numbers = #tpu.dot_dimension_numbers<[1], [0], [0], [1], [0, 0, 1, 1], [], []>} : vector<2x128xbf16>, vector<128x512xbf16>, vector<2x512xf32> -> vector<2x512xf32>
    %111 = arith.addf %107, %110 : vector<2x512xf32>
    %112 = vector.extract_strided_slice %111 {offsets = [0, 0], sizes = [2, 384], strides = [1, 1]} : vector<2x512xf32> to vector<2x384xf32>
    %113 = arith.negf %112 : vector<2x384xf32>
    %114 = math.exp %113 : vector<2x384xf32>
    %cst_34 = arith.constant 1.000000e+00 : f32
    %115 = vector.broadcast %cst_34 : f32 to vector<2x384xf32>
    %116 = arith.addf %115, %114 : vector<2x384xf32>
    %117 = arith.divf %115, %116 : vector<2x384xf32>
    %118 = vector.extract_strided_slice %111 {offsets = [0, 384], sizes = [2, 128], strides = [1, 1]} : vector<2x512xf32> to vector<2x128xf32>
    %119 = math.tanh %118 : vector<2x128xf32>
    %120 = vector.extract_strided_slice %117 {offsets = [0, 0], sizes = [2, 128], strides = [1, 1]} : vector<2x384xf32> to vector<2x128xf32>
    %121 = vector.extract_strided_slice %117 {offsets = [0, 128], sizes = [2, 128], strides = [1, 1]} : vector<2x384xf32> to vector<2x128xf32>
    %122 = vector.extract_strided_slice %117 {offsets = [0, 256], sizes = [2, 128], strides = [1, 1]} : vector<2x384xf32> to vector<2x128xf32>
    %123 = arith.mulf %121, %94 : vector<2x128xf32>
    %124 = arith.mulf %120, %119 : vector<2x128xf32>
    %125 = arith.addf %123, %124 : vector<2x128xf32>
    %126 = math.tanh %125 : vector<2x128xf32>
    %127 = arith.mulf %122, %126 : vector<2x128xf32>
    %c4_i32 = arith.constant 4 : i32
    %c0_i32_35 = arith.constant 0 : i32
    %128 = arith.addi %c0_i32_35, %c4_i32 : i32
    %129 = arith.index_cast %128 : i32 to index
    %130 = memref.load %arg0[%129] : memref<16xi32, #tpu.memory_space<smem>>
    %131 = arith.index_cast %130 : i32 to index
    %c0_36 = arith.constant 0 : index
    %132 = vector.load %arg1[%131, %c0_36] : memref<32x512xf32, #tpu.memory_space<vmem>>, vector<1x512xf32>
    %c8_i32_37 = arith.constant 8 : i32
    %133 = arith.addi %c8_i32_37, %c4_i32 : i32
    %134 = arith.index_cast %133 : i32 to index
    %135 = memref.load %arg0[%134] : memref<16xi32, #tpu.memory_space<smem>>
    %136 = arith.index_cast %135 : i32 to index
    %c0_38 = arith.constant 0 : index
    %137 = vector.load %arg1[%136, %c0_38] : memref<32x512xf32, #tpu.memory_space<vmem>>, vector<1x512xf32>
    %138 = tpu.concatenate %132, %137 in 0 : vector<1x512xf32>, vector<1x512xf32> -> vector<2x512xf32>
    %139 = arith.truncf %127 : vector<2x128xf32> to vector<2x128xbf16>
    %c0_39 = arith.constant 0 : index
    %c0_40 = arith.constant 0 : index
    %140 = vector.load %arg2[%c0_39, %c0_40] : memref<128x512xbf16, #tpu.memory_space<vmem>>, vector<128x512xbf16>
    %cst_41 = arith.constant dense<0.000000e+00> : vector<2x512xf32>
    %141 = tpu.matmul %139, %140, %cst_41 {dimension_numbers = #tpu.dot_dimension_numbers<[1], [0], [0], [1], [0, 0, 1, 1], [], []>} : vector<2x128xbf16>, vector<128x512xbf16>, vector<2x512xf32> -> vector<2x512xf32>
    %142 = arith.addf %138, %141 : vector<2x512xf32>
    %143 = vector.extract_strided_slice %142 {offsets = [0, 0], sizes = [2, 384], strides = [1, 1]} : vector<2x512xf32> to vector<2x384xf32>
    %144 = arith.negf %143 : vector<2x384xf32>
    %145 = math.exp %144 : vector<2x384xf32>
    %cst_42 = arith.constant 1.000000e+00 : f32
    %146 = vector.broadcast %cst_42 : f32 to vector<2x384xf32>
    %147 = arith.addf %146, %145 : vector<2x384xf32>
    %148 = arith.divf %146, %147 : vector<2x384xf32>
    %149 = vector.extract_strided_slice %142 {offsets = [0, 384], sizes = [2, 128], strides = [1, 1]} : vector<2x512xf32> to vector<2x128xf32>
    %150 = math.tanh %149 : vector<2x128xf32>
    %151 = vector.extract_strided_slice %148 {offsets = [0, 0], sizes = [2, 128], strides = [1, 1]} : vector<2x384xf32> to vector<2x128xf32>
    %152 = vector.extract_strided_slice %148 {offsets = [0, 128], sizes = [2, 128], strides = [1, 1]} : vector<2x384xf32> to vector<2x128xf32>
    %153 = vector.extract_strided_slice %148 {offsets = [0, 256], sizes = [2, 128], strides = [1, 1]} : vector<2x384xf32> to vector<2x128xf32>
    %154 = arith.mulf %152, %125 : vector<2x128xf32>
    %155 = arith.mulf %151, %150 : vector<2x128xf32>
    %156 = arith.addf %154, %155 : vector<2x128xf32>
    %157 = math.tanh %156 : vector<2x128xf32>
    %158 = arith.mulf %153, %157 : vector<2x128xf32>
    %c5_i32 = arith.constant 5 : i32
    %c0_i32_43 = arith.constant 0 : i32
    %159 = arith.addi %c0_i32_43, %c5_i32 : i32
    %160 = arith.index_cast %159 : i32 to index
    %161 = memref.load %arg0[%160] : memref<16xi32, #tpu.memory_space<smem>>
    %162 = arith.index_cast %161 : i32 to index
    %c0_44 = arith.constant 0 : index
    %163 = vector.load %arg1[%162, %c0_44] : memref<32x512xf32, #tpu.memory_space<vmem>>, vector<1x512xf32>
    %c8_i32_45 = arith.constant 8 : i32
    %164 = arith.addi %c8_i32_45, %c5_i32 : i32
    %165 = arith.index_cast %164 : i32 to index
    %166 = memref.load %arg0[%165] : memref<16xi32, #tpu.memory_space<smem>>
    %167 = arith.index_cast %166 : i32 to index
    %c0_46 = arith.constant 0 : index
    %168 = vector.load %arg1[%167, %c0_46] : memref<32x512xf32, #tpu.memory_space<vmem>>, vector<1x512xf32>
    %169 = tpu.concatenate %163, %168 in 0 : vector<1x512xf32>, vector<1x512xf32> -> vector<2x512xf32>
    %170 = arith.truncf %158 : vector<2x128xf32> to vector<2x128xbf16>
    %c0_47 = arith.constant 0 : index
    %c0_48 = arith.constant 0 : index
    %171 = vector.load %arg2[%c0_47, %c0_48] : memref<128x512xbf16, #tpu.memory_space<vmem>>, vector<128x512xbf16>
    %cst_49 = arith.constant dense<0.000000e+00> : vector<2x512xf32>
    %172 = tpu.matmul %170, %171, %cst_49 {dimension_numbers = #tpu.dot_dimension_numbers<[1], [0], [0], [1], [0, 0, 1, 1], [], []>} : vector<2x128xbf16>, vector<128x512xbf16>, vector<2x512xf32> -> vector<2x512xf32>
    %173 = arith.addf %169, %172 : vector<2x512xf32>
    %174 = vector.extract_strided_slice %173 {offsets = [0, 0], sizes = [2, 384], strides = [1, 1]} : vector<2x512xf32> to vector<2x384xf32>
    %175 = arith.negf %174 : vector<2x384xf32>
    %176 = math.exp %175 : vector<2x384xf32>
    %cst_50 = arith.constant 1.000000e+00 : f32
    %177 = vector.broadcast %cst_50 : f32 to vector<2x384xf32>
    %178 = arith.addf %177, %176 : vector<2x384xf32>
    %179 = arith.divf %177, %178 : vector<2x384xf32>
    %180 = vector.extract_strided_slice %173 {offsets = [0, 384], sizes = [2, 128], strides = [1, 1]} : vector<2x512xf32> to vector<2x128xf32>
    %181 = math.tanh %180 : vector<2x128xf32>
    %182 = vector.extract_strided_slice %179 {offsets = [0, 0], sizes = [2, 128], strides = [1, 1]} : vector<2x384xf32> to vector<2x128xf32>
    %183 = vector.extract_strided_slice %179 {offsets = [0, 128], sizes = [2, 128], strides = [1, 1]} : vector<2x384xf32> to vector<2x128xf32>
    %184 = vector.extract_strided_slice %179 {offsets = [0, 256], sizes = [2, 128], strides = [1, 1]} : vector<2x384xf32> to vector<2x128xf32>
    %185 = arith.mulf %183, %156 : vector<2x128xf32>
    %186 = arith.mulf %182, %181 : vector<2x128xf32>
    %187 = arith.addf %185, %186 : vector<2x128xf32>
    %188 = math.tanh %187 : vector<2x128xf32>
    %189 = arith.mulf %184, %188 : vector<2x128xf32>
    %c6_i32 = arith.constant 6 : i32
    %c0_i32_51 = arith.constant 0 : i32
    %190 = arith.addi %c0_i32_51, %c6_i32 : i32
    %191 = arith.index_cast %190 : i32 to index
    %192 = memref.load %arg0[%191] : memref<16xi32, #tpu.memory_space<smem>>
    %193 = arith.index_cast %192 : i32 to index
    %c0_52 = arith.constant 0 : index
    %194 = vector.load %arg1[%193, %c0_52] : memref<32x512xf32, #tpu.memory_space<vmem>>, vector<1x512xf32>
    %c8_i32_53 = arith.constant 8 : i32
    %195 = arith.addi %c8_i32_53, %c6_i32 : i32
    %196 = arith.index_cast %195 : i32 to index
    %197 = memref.load %arg0[%196] : memref<16xi32, #tpu.memory_space<smem>>
    %198 = arith.index_cast %197 : i32 to index
    %c0_54 = arith.constant 0 : index
    %199 = vector.load %arg1[%198, %c0_54] : memref<32x512xf32, #tpu.memory_space<vmem>>, vector<1x512xf32>
    %200 = tpu.concatenate %194, %199 in 0 : vector<1x512xf32>, vector<1x512xf32> -> vector<2x512xf32>
    %201 = arith.truncf %189 : vector<2x128xf32> to vector<2x128xbf16>
    %c0_55 = arith.constant 0 : index
    %c0_56 = arith.constant 0 : index
    %202 = vector.load %arg2[%c0_55, %c0_56] : memref<128x512xbf16, #tpu.memory_space<vmem>>, vector<128x512xbf16>
    %cst_57 = arith.constant dense<0.000000e+00> : vector<2x512xf32>
    %203 = tpu.matmul %201, %202, %cst_57 {dimension_numbers = #tpu.dot_dimension_numbers<[1], [0], [0], [1], [0, 0, 1, 1], [], []>} : vector<2x128xbf16>, vector<128x512xbf16>, vector<2x512xf32> -> vector<2x512xf32>
    %204 = arith.addf %200, %203 : vector<2x512xf32>
    %205 = vector.extract_strided_slice %204 {offsets = [0, 0], sizes = [2, 384], strides = [1, 1]} : vector<2x512xf32> to vector<2x384xf32>
    %206 = arith.negf %205 : vector<2x384xf32>
    %207 = math.exp %206 : vector<2x384xf32>
    %cst_58 = arith.constant 1.000000e+00 : f32
    %208 = vector.broadcast %cst_58 : f32 to vector<2x384xf32>
    %209 = arith.addf %208, %207 : vector<2x384xf32>
    %210 = arith.divf %208, %209 : vector<2x384xf32>
    %211 = vector.extract_strided_slice %204 {offsets = [0, 384], sizes = [2, 128], strides = [1, 1]} : vector<2x512xf32> to vector<2x128xf32>
    %212 = math.tanh %211 : vector<2x128xf32>
    %213 = vector.extract_strided_slice %210 {offsets = [0, 0], sizes = [2, 128], strides = [1, 1]} : vector<2x384xf32> to vector<2x128xf32>
    %214 = vector.extract_strided_slice %210 {offsets = [0, 128], sizes = [2, 128], strides = [1, 1]} : vector<2x384xf32> to vector<2x128xf32>
    %215 = vector.extract_strided_slice %210 {offsets = [0, 256], sizes = [2, 128], strides = [1, 1]} : vector<2x384xf32> to vector<2x128xf32>
    %216 = arith.mulf %214, %187 : vector<2x128xf32>
    %217 = arith.mulf %213, %212 : vector<2x128xf32>
    %218 = arith.addf %216, %217 : vector<2x128xf32>
    %219 = math.tanh %218 : vector<2x128xf32>
    %220 = arith.mulf %215, %219 : vector<2x128xf32>
    %c7_i32 = arith.constant 7 : i32
    %c0_i32_59 = arith.constant 0 : i32
    %221 = arith.addi %c0_i32_59, %c7_i32 : i32
    %222 = arith.index_cast %221 : i32 to index
    %223 = memref.load %arg0[%222] : memref<16xi32, #tpu.memory_space<smem>>
    %224 = arith.index_cast %223 : i32 to index
    %c0_60 = arith.constant 0 : index
    %225 = vector.load %arg1[%224, %c0_60] : memref<32x512xf32, #tpu.memory_space<vmem>>, vector<1x512xf32>
    %c8_i32_61 = arith.constant 8 : i32
    %226 = arith.addi %c8_i32_61, %c7_i32 : i32
    %227 = arith.index_cast %226 : i32 to index
    %228 = memref.load %arg0[%227] : memref<16xi32, #tpu.memory_space<smem>>
    %229 = arith.index_cast %228 : i32 to index
    %c0_62 = arith.constant 0 : index
    %230 = vector.load %arg1[%229, %c0_62] : memref<32x512xf32, #tpu.memory_space<vmem>>, vector<1x512xf32>
    %231 = tpu.concatenate %225, %230 in 0 : vector<1x512xf32>, vector<1x512xf32> -> vector<2x512xf32>
    %232 = arith.truncf %220 : vector<2x128xf32> to vector<2x128xbf16>
    %c0_63 = arith.constant 0 : index
    %c0_64 = arith.constant 0 : index
    %233 = vector.load %arg2[%c0_63, %c0_64] : memref<128x512xbf16, #tpu.memory_space<vmem>>, vector<128x512xbf16>
    %cst_65 = arith.constant dense<0.000000e+00> : vector<2x512xf32>
    %234 = tpu.matmul %232, %233, %cst_65 {dimension_numbers = #tpu.dot_dimension_numbers<[1], [0], [0], [1], [0, 0, 1, 1], [], []>} : vector<2x128xbf16>, vector<128x512xbf16>, vector<2x512xf32> -> vector<2x512xf32>
    %235 = arith.addf %231, %234 : vector<2x512xf32>
    %236 = vector.extract_strided_slice %235 {offsets = [0, 0], sizes = [2, 384], strides = [1, 1]} : vector<2x512xf32> to vector<2x384xf32>
    %237 = arith.negf %236 : vector<2x384xf32>
    %238 = math.exp %237 : vector<2x384xf32>
    %cst_66 = arith.constant 1.000000e+00 : f32
    %239 = vector.broadcast %cst_66 : f32 to vector<2x384xf32>
    %240 = arith.addf %239, %238 : vector<2x384xf32>
    %241 = arith.divf %239, %240 : vector<2x384xf32>
    %242 = vector.extract_strided_slice %235 {offsets = [0, 384], sizes = [2, 128], strides = [1, 1]} : vector<2x512xf32> to vector<2x128xf32>
    %243 = math.tanh %242 : vector<2x128xf32>
    %244 = vector.extract_strided_slice %241 {offsets = [0, 0], sizes = [2, 128], strides = [1, 1]} : vector<2x384xf32> to vector<2x128xf32>
    %245 = vector.extract_strided_slice %241 {offsets = [0, 128], sizes = [2, 128], strides = [1, 1]} : vector<2x384xf32> to vector<2x128xf32>
    %246 = vector.extract_strided_slice %241 {offsets = [0, 256], sizes = [2, 128], strides = [1, 1]} : vector<2x384xf32> to vector<2x128xf32>
    %247 = arith.mulf %245, %218 : vector<2x128xf32>
    %248 = arith.mulf %244, %243 : vector<2x128xf32>
    %249 = arith.addf %247, %248 : vector<2x128xf32>
    %250 = math.tanh %249 : vector<2x128xf32>
    %251 = arith.mulf %246, %250 : vector<2x128xf32>
    %c8_i32_67 = arith.constant 8 : i32
    %c0_68 = arith.constant 0 : index
    %c0_69 = arith.constant 0 : index
    %c0_70 = arith.constant 0 : index
    %252 = vector.load %arg8[%c0_68, %c0_69, %c0_70] : memref<1x2x128xf32, #tpu.memory_space<vmem>>, vector<1x2x128xf32>
    %253 = vector.shape_cast %252 : vector<1x2x128xf32> to vector<2x128xf32>
    %254 = vector.shape_cast %251 : vector<2x128xf32> to vector<1x2x128xf32>
    tpu.vector_store %arg8[%c0_68, %c0_69, %c0_70], %254 {strides = array<i32>} : memref<1x2x128xf32, #tpu.memory_space<vmem>>, vector<1x2x128xf32>,
    %c0_71 = arith.constant 0 : index
    %c0_72 = arith.constant 0 : index
    %c0_73 = arith.constant 0 : index
    %255 = vector.load %arg9[%c0_71, %c0_72, %c0_73] : memref<1x2x128xf32, #tpu.memory_space<vmem>>, vector<1x2x128xf32>
    %256 = vector.shape_cast %255 : vector<1x2x128xf32> to vector<2x128xf32>
    %257 = vector.shape_cast %249 : vector<2x128xf32> to vector<1x2x128xf32>
    tpu.vector_store %arg9[%c0_71, %c0_72, %c0_73], %257 {strides = array<i32>} : memref<1x2x128xf32, #tpu.memory_space<vmem>>, vector<1x2x128xf32>,
    %c0_74 = arith.constant 0 : index
    %c0_75 = arith.constant 0 : index
    %258 = vector.load %arg5[%c0_74, %c0_75] : memref<1x128xf32, #tpu.memory_space<vmem>>, vector<1x128xf32>
    %259 = vector.broadcast %258 : vector<1x128xf32> to vector<2x128xf32>
    %260 = arith.mulf %251, %259 : vector<2x128xf32>
    %cst_76 = arith.constant dense<0.000000e+00> : vector<2xf32>
    %261 = vector.multi_reduction <add>, %260, %cst_76 [1] : vector<2x128xf32> to vector<2xf32>
    %262 = vector.shape_cast %261 : vector<2xf32> to vector<2x1xf32>
    %c0_77 = arith.constant 0 : index
    %c0_78 = arith.constant 0 : index
    %263 = vector.load %arg6[%c0_77, %c0_78] : memref<1x1xf32, #tpu.memory_space<vmem>>, vector<1x1xf32>
    %264 = vector.broadcast %263 : vector<1x1xf32> to vector<2x1xf32>
    %265 = arith.addf %262, %264 : vector<2x1xf32>
    %266 = arith.negf %265 : vector<2x1xf32>
    %267 = math.exp %266 : vector<2x1xf32>
    %cst_79 = arith.constant 1.000000e+00 : f32
    %268 = vector.broadcast %cst_79 : f32 to vector<2x1xf32>
    %269 = arith.addf %268, %267 : vector<2x1xf32>
    %270 = arith.divf %268, %269 : vector<2x1xf32>
    %c0_80 = arith.constant 0 : index
    %c0_81 = arith.constant 0 : index
    %271 = vector.load %arg7[%c0_80, %c0_81] : memref<2x1xf32, #tpu.memory_space<vmem>>, vector<2x1xf32>
    tpu.vector_store %arg7[%c0_80, %c0_81], %270 {strides = array<i32>} : memref<2x1xf32, #tpu.memory_space<vmem>>, vector<2x1xf32>,
    return
  }
}

</mosaic_0001>

<bundles_post_ra>
// kernel: lstm_forward.1
= control target key start
LH: loop header
LB: loop body
LE: loop exit
PB: predicated region body
PF: predicated region fallthrough
CT: control target
= control target key end

     0   :  { %s2911_s0 = inlined_call_operand.vmem [shape: s32[16], index: 0, kind: input, shape index: {}]   ;;  %s2912_s1 = inlined_call_operand.hbm [shape: f32[32,512], index: 1, kind: input, shape index: {}]   ;;  %s2913_s2 = inlined_call_operand.hbm [shape: bf16[128,512], index: 2, kind: input, shape index: {}]   ;;  %s2914_s3 = inlined_call_operand.vmem [shape: f32[1,2,128], index: 3, kind: input, shape index: {}]   ;;  %s2915_s4 = inlined_call_operand.vmem [shape: f32[1,2,128], index: 4, kind: input, shape index: {}]   ;;  %s2916_s5 = inlined_call_operand.vmem [shape: f32[1,128], index: 5, kind: input, shape index: {}]   ;;  %s2917_s6 = inlined_call_operand.<no memory space> [shape: f32[1,1], index: 6, kind: input, shape index: {}]   ;;  %s2918_s7 = inlined_call_operand.vmem [shape: f32[2,1], index: 7, kind: output, shape index: {0}]   ;;  %s2919_s8 = inlined_call_operand.hbm [shape: f32[1,2,128], index: 8, kind: output, shape index: {1}]   ;;  %s2920_s9 = inlined_call_operand.hbm [shape: f32[1,2,128], index: 9, kind: output, shape index: {2}]  }
   0x1   :  { %v15_v0 = vstv %s2917_s6 }
   0x2   :  { %16 = vst [vmem:[#allocation2] sm:$0x1] %v15_v0 }
   0x3   :  { %17 = vsyncpa [#allocation6], 0 }
   0x4   :  { %18 = vsyncpa [#allocation4], 0 }
   0x5   :  { %19 = vsyncpa [#allocation9], 0 }
   0x6   :  { %20 = vsyncpa [#allocation5], 0 }
   0x7   :  { %21 = vsyncpa [#allocation12], 0  ;;  %s28_s13 = sshll.u32 %s2911_s0, 4  ;;  %s29_s13 = int_to_ptr.vmem [resolvable:$true] %s28_s13 }
   0x8   :  { %s2143_s14 = scalar_lea.vmem %s29_s13, 16  ;;  %p2148_p1 = scmp.lt.s32.totalorder %s29_s13, %s29_s13 }
   0x9   :  { %p2144_p0 = scmp.ne.s32.totalorder %s29_s13, %s2143_s14  ;;  %p2149_p2 = scmp.lt.s32.totalorder %s2143_s14, %s2143_s14 }
   0xb   :  { %p2150_p3 = por %p2149_p2, %p2148_p1 }
   0xd   :  { %p2151_p4 = pnand %p2150_p3, %p2144_p0 }
   0xf   :  { %2154 = shalt.err (!%p2151_p4)
}
  0x10   :  { %s2253_s15 = smov [#allocation3]   ;;  %s2254_s6 = smov [#allocation7]  }
  0x11   :  { %31 = dma.vmem_to_smem %s29_s13, 16, %s2253_s15, [#allocation6]  }
  0x12   :  { %s37_s16 = sshll.u32 %s2254_s6, 4  ;;  %s2155_s19 = scalar_lea.hbm %s2912_s1, 2048  ;;  %s38_s16 = int_to_ptr.vmem [resolvable:$true] %s37_s16 }
  0x13   :  { %p2156_p5 = scmp.ne.s32.totalorder %s2912_s1, %s2155_s19  ;;  %p2159_p6 = scmp.lt.u32.totalorder %s2155_s19, %s2912_s1 }
  0x15   :  { %p2161_p7 = pnand %p2159_p6, %p2156_p5 }
  0x17   :  { %2164 = shalt.err (!%p2161_p7)
}
  0x18   :  { %s2165_s23 = scalar_lea.vmem %s38_s16, 2048  ;;  %p2170_p9 = scmp.lt.s32.totalorder %s38_s16, %s38_s16 }
  0x19   :  { %p2166_p8 = scmp.ne.s32.totalorder %s38_s16, %s2165_s23  ;;  %p2171_p10 = scmp.lt.s32.totalorder %s2165_s23, %s2165_s23 }
  0x1b   :  { %p2172_p11 = por %p2171_p10, %p2170_p9 }
  0x1d   :  { %p2173_p12 = pnand %p2172_p11, %p2166_p8 }
  0x1f   :  { %2176 = shalt.err (!%p2173_p12)
}
  0x20   :  { %s2255_s24 = smov 512   ;;  %s2256_s25 = smov 32  }
  0x21   :  { %43 = dma.hbm_to_vmem [thread:$0]  %s2912_s1, 2048, %s38_s16, [#allocation4], %s2255_s24, %s2255_s24, %s2256_s25  }
  0x22   :  { %s2257_s28 = smov [#allocation8]   ;;  %s2177_s11 = scalar_lea.hbm %s2913_s2, 4096 }
  0x23   :  { %s49_s29 = sshll.u32 %s2257_s28, 4  ;;  %p2178_p13 = scmp.ne.s32.totalorder %s2913_s2, %s2177_s11  ;;  %s50_s29 = int_to_ptr.vmem [resolvable:$true] %s49_s29 }
  0x24   :  { %p2181_p0 = scmp.lt.u32.totalorder %s2177_s11, %s2913_s2 }
  0x26   :  { %p2183_p1 = pnand %p2181_p0, %p2178_p13 }
  0x28   :  { %2186 = shalt.err (!%p2183_p1)
}
  0x29   :  { %s2187_s6 = scalar_lea.vmem %s50_s29, 4096  ;;  %p2192_p3 = scmp.lt.s32.totalorder %s50_s29, %s50_s29 }
  0x2a   :  { %p2188_p2 = scmp.ne.s32.totalorder %s50_s29, %s2187_s6  ;;  %p2193_p4 = scmp.lt.s32.totalorder %s2187_s6, %s2187_s6 }
  0x2c   :  { %p2194_p5 = por %p2193_p4, %p2192_p3 }
  0x2e   :  { %p2195_p6 = pnand %p2194_p5, %p2188_p2 }
  0x30   :  { %2198 = shalt.err (!%p2195_p6)
}
  0x31   :  { %s2258_s1 = smov 256   ;;  %s2259_s16 = smov 16  }
  0x32   :  { %55 = dma.hbm_to_vmem [thread:$0]  %s2913_s2, 4096, %s50_s29, [#allocation9], %s2258_s1, %s2258_s1, %s2259_s16  }
  0x33   :  { %2243 = dma.done.wait [#allocation6], 16  }
  0x34   :  { %2244 = vsyncadd [#allocation6], 4294967280 }
  0x35   :  { %2245 = dma.done.wait [#allocation4], 2048  }
  0x36   :  { %2246 = vsyncadd [#allocation4], 4294965248 }
  0x37   :  { %2247 = dma.done.wait [#allocation9], 4096  }
  0x38   :  { %2248 = vsyncadd [#allocation9], 4294963200 }
  0x39   :  { %73 = sfence }
  0x3a   :  { %v2343_v1 = vld [vmem:[#allocation8 + $0x4] ss:$16 sps:$4 sm:$0xff]   ;;  %v2345_v2 = vld [vmem:[#allocation8] ss:$16 sps:$4 sm:$0xff]   ;;  %v2260_v3 = vmov 0   ;;  %s1801_s20 = sld [smem:[#allocation3 + $0x8]]  ;;  %v98_v36 = vlaneseq }
  0x3b   :  { %369 = vmatprep.mubr.bf16.mxu0 %v2260_v3  ;;  %410 = vmatprep.mubr.bf16.mxu1 %v2260_v3  ;;  %v2350_v4 = vld [vmem:[#allocation8 + $0x24] ss:$16 sps:$4 sm:$0xff]   ;;  %v2353_v5 = vld [vmem:[#allocation8 + $0x20] ss:$16 sps:$4 sm:$0xff]   ;;  %v2358_v7 = vld [vmem:[#allocation8 + $0xc] ss:$16 sps:$4 sm:$0xff]  }
  0x3c   :  { %337 = vmatprep.subr.bf16.mxu0 %v2343_v1  ;;  %v2356_v6 = vld [vmem:[#allocation8 + $0x44] ss:$16 sps:$4 sm:$0xff]   ;;  %v2360_v8 = vld [vmem:[#allocation8 + $0x8] ss:$16 sps:$4 sm:$0xff]   ;;  %v2363_v9 = vld [vmem:[#allocation8 + $0x40] ss:$16 sps:$4 sm:$0xff]   ;;  %378 = vmatprep.subr.bf16.mxu1 %v2358_v7 }
  0x3d   :  { %338 = vmatpush1.bf16.msra.mxu0 %v2345_v2  ;;  %v2367_v10 = vld [vmem:[#allocation8 + $0x64] ss:$16 sps:$4 sm:$0xff]   ;;  %379 = vmatpush1.bf16.msra.mxu1 %v2360_v8  ;;  %v2370_v11 = vld [vmem:[#allocation8 + $0x2c] ss:$16 sps:$4 sm:$0xff]   ;;  %v2372_v12 = vld [vmem:[#allocation8 + $0x28] ss:$16 sps:$4 sm:$0xff]  }
  0x3e   :  { %339 = vmatprep.subr.bf16.mxu0 %v2350_v4  ;;  %380 = vmatprep.subr.bf16.mxu1 %v2370_v11  ;;  %v2376_v13 = vld [vmem:[#allocation8 + $0x60] ss:$16 sps:$4 sm:$0xff]   ;;  %v2378_v14 = vld [vmem:[#allocation8 + $0x84] ss:$16 sps:$4 sm:$0xff]   ;;  %v2380_v15 = vld [vmem:[#allocation8 + $0x4c] ss:$16 sps:$4 sm:$0xff]  }
  0x3f   :  { %v2384_v16 = vld [vmem:[#allocation8 + $0x48] ss:$16 sps:$4 sm:$0xff]   ;;  %v2387_v17 = vld [vmem:[#allocation8 + $0x6c] ss:$16 sps:$4 sm:$0xff]   ;;  %v2390_v18 = vld [vmem:[#allocation8 + $0x80] ss:$16 sps:$4 sm:$0xff]  }
  0x40   :  { %v2393_v19 = vld [vmem:[#allocation8 + $0xa4] ss:$16 sps:$4 sm:$0xff]   ;;  %v2396_v20 = vld [vmem:[#allocation8 + $0x68] ss:$16 sps:$4 sm:$0xff]   ;;  %v2399_v21 = vld [vmem:[#allocation8 + $0x8c] ss:$16 sps:$4 sm:$0xff]  }
  0x41   :  { %340 = vmatpush1.bf16.msra.mxu0 %v2353_v5  ;;  %381 = vmatpush1.bf16.msra.mxu1 %v2372_v12  ;;  %v2401_v22 = vld [vmem:[#allocation8 + $0xa0] ss:$16 sps:$4 sm:$0xff]   ;;  %v2404_v23 = vld [vmem:[#allocation8 + $0xc4] ss:$16 sps:$4 sm:$0xff]   ;;  %v2408_v24 = vld [vmem:[#allocation8 + $0x88] ss:$16 sps:$4 sm:$0xff]  }
  0x42   :  { %341 = vmatprep.subr.bf16.mxu0 %v2356_v6  ;;  %382 = vmatprep.subr.bf16.mxu1 %v2380_v15  ;;  %v2411_v25 = vld [vmem:[#allocation8 + $0xac] ss:$16 sps:$4 sm:$0xff]   ;;  %v2414_v26 = vld [vmem:[#allocation8 + $0xc0] ss:$16 sps:$4 sm:$0xff]   ;;  %v2417_v27 = vld [vmem:[#allocation8 + $0xe4] ss:$16 sps:$4 sm:$0xff]  }
  0x43   :  { %v2420_v28 = vld [vmem:[#allocation8 + $0xa8] ss:$16 sps:$4 sm:$0xff]   ;;  %v2423_v29 = vld [vmem:[#allocation8 + $0xcc] ss:$16 sps:$4 sm:$0xff]   ;;  %v2426_v30 = vld [vmem:[#allocation8 + $0xe0] ss:$16 sps:$4 sm:$0xff]  }
  0x44   :  { %v75_v31 = vld [vmem:[%s2914_s3] sm:$0x3]  ;;  %v2433_v32 = vld [vmem:[#allocation8 + $0xc8] ss:$16 sps:$4 sm:$0xff]   ;;  %s77_s3 = sld [smem:[#allocation3]]  ;;  %s88_s0 = sshra.s32 %s1801_s20, 3 }
  0x45   :  { %342 = vmatpush1.bf16.msra.mxu0 %v2363_v9  ;;  %383 = vmatpush1.bf16.msra.mxu1 %v2384_v16  ;;  %v2436_v33 = vld [vmem:[#allocation8 + $0xec] ss:$16 sps:$4 sm:$0xff]   ;;  %v144_v34 = vpack.c.bf16 %v75_v31, %v75_v31  ;;  %v2440_v35 = vld [vmem:[#allocation8 + $0xe8] ss:$16 sps:$4 sm:$0xff]   ;;  %s91_s24 = sand.u32 7, %s1801_s20  ;;  %s1906_s25 = sshll.u32 %s88_s0, 5 }
  0x46   :  { %343 = vmatprep.subr.bf16.mxu0 %v2367_v10  ;;  %384 = vmatprep.subr.bf16.mxu1 %v2387_v17  ;;  %s94_s27 = sadd.s32 %s1906_s25, %s91_s24  ;;  %v99_v37 = vshrl.u32 %v98_v36, 7  ;;  %vm139_vm0 = vcmask 1040384   ;;  %s1842_s11 = sld [smem:[#allocation3 + $0x9]]  ;;  %vm1696_vm1 = vcmask 1041408  }
  0x47   :  { %s95_s29 = scalar_lea.vmem [#allocation7], %s94_s27  ;;  %s1848_s19 = sld [smem:[#allocation3 + $0x2]] }
  0x48   :  { %v2480_v39 = vsub.s32 0, %v99_v37  ;;  %v96_v40 = vld [vmem:[%s95_s29] ss:$8 sm:$0xf]  ;;  %v2482_v41 = vsub.s32 1, %v99_v37  ;;  %v2488_v46 = vsub.s32 2, %v99_v37 }
  0x49   :  { %344 = vmatpush1.bf16.msra.mxu0 %v2376_v13  ;;  %385 = vmatpush1.bf16.msra.mxu1 %v2396_v20  ;;  %v2494_v54 = vsub.s32 3, %v99_v37  ;;  %s1857_s29 = sld [smem:[#allocation3 + $0x3]] }
  0x4a   :  { %345 = vmatprep.subr.bf16.mxu0 %v2378_v14  ;;  %386 = vmatprep.subr.bf16.mxu1 %v2399_v21  ;;  %s78_s21 = sshra.s32 %s77_s3, 3  ;;  %s81_s22 = sand.u32 7, %s77_s3  ;;  %v122_v43 = vrot.slane %v96_v40, %v2480_v39  ;;  %v126_v45 = vrot.slane %v96_v40, %v2482_v41  ;;  %v130_v51 = vrot.slane %v96_v40, %v2488_v46 }
  0x4b   :  { %s1905_s23 = sshll.u32 %s78_s21, 5  ;;  %v134_v63 = vrot.slane %v96_v40, %v2494_v54  ;;  %v76_v40 = vld [vmem:[%s2915_s4] sm:$0x3]  ;;  %s1839_s4 = sld [smem:[#allocation3 + $0x1]] }
  0x4c   :  { %s84_s26 = sadd.s32 %s1905_s23, %s81_s22  ;;  %s458_s13 = sshra.s32 %s1842_s11, 3 }
  0x4d   :  { %346 = vmatpush1.bf16.msra.mxu0 %v2390_v18  ;;  %387 = vmatpush1.bf16.msra.mxu1 %v2408_v24  ;;  %s85_s28 = scalar_lea.vmem [#allocation7], %s84_s26  ;;  %s461_s6 = sand.u32 7, %s1842_s11 }
  0x4e   :  { %347 = vmatprep.subr.bf16.mxu0 %v2393_v19  ;;  %388 = vmatprep.subr.bf16.mxu1 %v2411_v25  ;;  %v86_v38 = vld [vmem:[%s85_s28] ss:$8 sm:$0xf]  ;;  %s1908_s1 = sshll.u32 %s458_s13, 5  ;;  %s1851_s3 = sld [smem:[#allocation3 + $0xa]] }
  0x4f   :  { %v101_v42 = vrot.slane %v86_v38, %v2480_v39  ;;  %v105_v44 = vrot.slane %v86_v38, %v2482_v41  ;;  %v109_v50 = vrot.slane %v86_v38, %v2488_v46  ;;  %v113_v62 = vrot.slane %v86_v38, %v2494_v54  ;;  %s464_s17 = sadd.s32 %s1908_s1, %s461_s6  ;;  %s625_s20 = sshra.s32 %s1848_s19, 3 }
  0x50   :  { %s465_s2 = scalar_lea.vmem [#allocation7], %s464_s17  ;;  %s628_s0 = sand.u32 7, %s1848_s19 }
  0x51   :  { %348 = vmatpush1.bf16.msra.mxu0 %v2401_v22  ;;  %389 = vmatpush1.bf16.msra.mxu1 %v2420_v28  ;;  %v140_v47 = vsel %vm139_vm0, %v101_v42, %v122_v43  ;;  %v141_v48 = vsel %vm139_vm0, %v105_v44, %v126_v45  ;;  %v142_v60 = vsel %vm139_vm0, %v109_v50, %v130_v51  ;;  %s448_s12 = sshra.s32 %s1839_s4, 3  ;;  %s451_s14 = sand.u32 7, %s1839_s4 }
  0x52   :  { %349 = vmatprep.subr.bf16.mxu0 %v2404_v23  ;;  %390 = vmatprep.subr.bf16.mxu1 %v2423_v29  ;;  %v143_v37 = vsel %vm139_vm0, %v113_v62, %v134_v63  ;;  %s1907_s15 = sshll.u32 %s448_s12, 5  ;;  %v466_v62 = vld [vmem:[%s465_s2] ss:$8 sm:$0xf]  ;;  %s1909_s22 = sshll.u32 %s625_s20, 5 }
  0x53   :  { %s454_s16 = sadd.s32 %s1907_s15, %s451_s14  ;;  %s631_s25 = sadd.s32 %s1909_s22, %s628_s0 }
  0x54   :  { %s455_s18 = scalar_lea.vmem [#allocation7], %s454_s16  ;;  %s635_s21 = sshra.s32 %s1851_s3, 3 }
  0x55   :  { %350 = vmatpush1.bf16.msra.mxu0 %v2414_v26  ;;  %391 = vmatpush1.bf16.msra.mxu1 %v2433_v32  ;;  %s638_s23 = sand.u32 7, %s1851_s3  ;;  %s1910_s24 = sshll.u32 %s635_s21, 5 }
  0x56   :  { %351 = vmatprep.subr.bf16.mxu0 %v2417_v27  ;;  %392 = vmatprep.subr.bf16.mxu1 %v2436_v33  ;;  %s641_s26 = sadd.s32 %s1910_s24, %s638_s23  ;;  %s632_s27 = scalar_lea.vmem [#allocation7], %s631_s25 }
  0x57   :  { %s642_s28 = scalar_lea.vmem [#allocation7], %s641_s26  ;;  %s1860_s30 = sld [smem:[#allocation3 + $0xb]] }
  0x58   :  { %s802_s10 = sshra.s32 %s1857_s29, 3  ;;  %s805_s11 = sand.u32 7, %s1857_s29 }
  0x59   :  { %352 = vmatpush1.bf16.msra.mxu0 %v2426_v30  ;;  %393 = vmatpush1.bf16.msra.mxu1 %v2440_v35  ;;  %s1911_s12 = sshll.u32 %s802_s10, 5  ;;  %s1866_s17 = sld [smem:[#allocation3 + $0x4]] }
  0x5a   :  { %514 = vmatprep.subr.bf16.mxu0 %v2343_v1  ;;  %555 = vmatprep.subr.bf16.mxu1 %v2358_v7  ;;  %s808_s15 = sadd.s32 %s1911_s12, %s805_s11  ;;  %s1875_s26 = sld [smem:[#allocation3 + $0x5]] }
  0x5b   :  { %s809_s1 = scalar_lea.vmem [#allocation7], %s808_s15 }
  0x5c   :  { %370 = vmatmul.mubr.bf16.vlgmr.msra.gmra.mrb[0].mxu0 %v144_v34  ;;  %411 = vmatmul.mubr.bf16.vlgmr.msra.gmra.mrb[0].mxu1 %v144_v34 }
  0x5d   :  { %515 = vmatpush1.bf16.msra.mxu0 %v2345_v2  ;;  %546 = vmatprep.mubr.bf16.mxu0 %v2260_v3  ;;  %s812_s4 = sshra.s32 %s1860_s30, 3  ;;  %s815_s13 = sand.u32 7, %s1860_s30 }
  0x5e   :  { %516 = vmatprep.subr.bf16.mxu0 %v2350_v4  ;;  %556 = vmatpush1.bf16.msra.mxu1 %v2360_v8  ;;  %s1912_s14 = sshll.u32 %s812_s4, 5 }
  0x5f   :  { %557 = vmatprep.subr.bf16.mxu1 %v2370_v11  ;;  %587 = vmatprep.mubr.bf16.mxu1 %v2260_v3  ;;  %s818_s6 = sadd.s32 %s1912_s14, %s815_s13  ;;  %s979_s2 = sshra.s32 %s1866_s17, 3 }
  0x60   :  { %s819_s16 = scalar_lea.vmem [#allocation7], %s818_s6  ;;  %s982_s3 = sand.u32 7, %s1866_s17 }
  0x61   :  { %517 = vmatpush1.bf16.msra.mxu0 %v2353_v5  ;;  %s1913_s20 = sshll.u32 %s979_s2, 5  ;;  %s1159_s30 = sand.u32 7, %s1875_s26 }
  0x62   :  { %518 = vmatprep.subr.bf16.mxu0 %v2356_v6  ;;  %558 = vmatpush1.bf16.msra.mxu1 %v2372_v12  ;;  %s985_s22 = sadd.s32 %s1913_s20, %s982_s3  ;;  %s1884_s6 = sld [smem:[#allocation3 + $0x6]] }
  0x63   :  { %559 = vmatprep.subr.bf16.mxu1 %v2380_v15  ;;  %s986_s24 = scalar_lea.vmem [#allocation7], %s985_s22 }
  0x65   :  { %519 = vmatpush1.bf16.msra.mxu0 %v2363_v9 }
  0x66   :  { %520 = vmatprep.subr.bf16.mxu0 %v2367_v10  ;;  %560 = vmatpush1.bf16.msra.mxu1 %v2384_v16 }
  0x67   :  { %561 = vmatprep.subr.bf16.mxu1 %v2387_v17 }
  0x69   :  { %521 = vmatpush1.bf16.msra.mxu0 %v2376_v13 }
  0x6a   :  { %522 = vmatprep.subr.bf16.mxu0 %v2378_v14  ;;  %562 = vmatpush1.bf16.msra.mxu1 %v2396_v20 }
  0x6b   :  { %563 = vmatprep.subr.bf16.mxu1 %v2399_v21 }
  0x6d   :  { %523 = vmatpush1.bf16.msra.mxu0 %v2390_v18 }
  0x6e   :  { %524 = vmatprep.subr.bf16.mxu0 %v2393_v19  ;;  %564 = vmatpush1.bf16.msra.mxu1 %v2408_v24 }
  0x6f   :  { %565 = vmatprep.subr.bf16.mxu1 %v2411_v25 }
  0x71   :  { %525 = vmatpush1.bf16.msra.mxu0 %v2401_v22 }
  0x72   :  { %526 = vmatprep.subr.bf16.mxu0 %v2404_v23  ;;  %566 = vmatpush1.bf16.msra.mxu1 %v2420_v28 }
  0x73   :  { %567 = vmatprep.subr.bf16.mxu1 %v2423_v29 }
  0x75   :  { %527 = vmatpush1.bf16.msra.mxu0 %v2414_v26 }
  0x76   :  { %528 = vmatprep.subr.bf16.mxu0 %v2417_v27  ;;  %568 = vmatpush1.bf16.msra.mxu1 %v2433_v32 }
  0x77   :  { %569 = vmatprep.subr.bf16.mxu1 %v2436_v33 }
  0x79   :  { %529 = vmatpush1.bf16.msra.mxu0 %v2426_v30 }
  0x7a   :  { %691 = vmatprep.subr.bf16.mxu0 %v2343_v1  ;;  %570 = vmatpush1.bf16.msra.mxu1 %v2440_v35 }
  0x7b   :  { %732 = vmatprep.subr.bf16.mxu1 %v2358_v7 }
 0x12f   :  { %v371_v49 = vpop.f32.mrb[0].mxu0  ;;  %v412_v61 = vpop.f32.mrb[0].mxu1 }
 0x130   :  { %v419_v52 = vadd.f32 %v371_v49, %v140_v47  ;;  %v373_v53 = vpop.f32.mrb[1].mxu0  ;;  %v414_v0 = vpop.f32.mrb[1].mxu1  ;;  %v421_v31 = vadd.f32 %v412_v61, %v142_v60  ;;  %v456_v61 = vld [vmem:[%s455_s18] ss:$8 sm:$0xf]  ;;  %s1869_s18 = sld [smem:[#allocation3 + $0xc]] }
 0x131   :  { %v420_v55 = vadd.f32 %v373_v53, %v141_v48  ;;  %v375_v56 = vpop.f32.mrb[2].mxu0  ;;  %v416_v34 = vpop.f32.mrb[2].mxu1  ;;  %v422_v43 = vadd.f32 %v414_v0, %v143_v37  ;;  %v471_v63 = vrot.slane %v456_v61, %v2480_v39  ;;  %v492_v0 = vrot.slane %v466_v62, %v2480_v39 }
 0x132   :  { %v1836_v57 = vmul.f32 -1.442695, %v419_v52  ;;  %v376_v58 = vpop.f32.mrb[3].mxu0  ;;  %v417_v36 = vpop.f32.mrb[3].mxu1  ;;  %v1838_v42 = vmul.f32 -1.442695, %v421_v31  ;;  %v475_v31 = vrot.slane %v456_v61, %v2482_v41  ;;  %v496_v34 = vrot.slane %v466_v62, %v2482_v41 }
 0x133   :  { %v1837_v59 = vmul.f32 -1.442695, %v420_v55  ;;  %v509_v36 = vsel %vm139_vm0, %v471_v63, %v492_v0 }
 0x134   :  { %1979 = vpow2.f32 %v1836_v57  ;;  %v510_v37 = vsel %vm139_vm0, %v475_v31, %v496_v34 }
 0x135   :  { %1981 = vpow2.f32 %v1837_v59 }
 0x136   :  { %1983 = vpow2.f32 %v1838_v42  ;;  %s989_s19 = sshra.s32 %s1869_s18, 3  ;;  %s992_s21 = sand.u32 7, %s1869_s18 }
 0x137   :  { %1985 = vtanh.f32 %v422_v43  ;;  %s1914_s0 = sshll.u32 %s989_s19, 5  ;;  %s1336_s18 = sand.u32 7, %s1884_s6 }
 0x138   :  { %s995_s23 = sadd.s32 %s1914_s0, %s992_s21 }
 0x139   :  { %s996_s25 = scalar_lea.vmem [#allocation7], %s995_s23  ;;  %s1893_s23 = sld [smem:[#allocation3 + $0x7]] }
 0x13e   :  { %v1980_v44 = vpop.eup %1979 }
 0x13f   :  { %v1982_v45 = vpop.eup %1981  ;;  %v432_v47 = vadd.f32 1.0, %v1980_v44 }
 0x140   :  { %v433_v48 = vadd.f32 1.0, %v1982_v45  ;;  %v1984_v38 = vpop.eup %1983 }
 0x141   :  { %1987 = vrcp.f32 %v432_v47  ;;  %v1986_v49 = vpop.eup %1985  ;;  %v434_v51 = vadd.f32 1.0, %v1984_v38  ;;  %v500_v38 = vrot.slane %v466_v62, %v2488_v46 }
 0x142   :  { %1989 = vrcp.f32 %v433_v48  ;;  %v479_v48 = vrot.slane %v456_v61, %v2488_v46 }
 0x143   :  { %1991 = vrcp.f32 %v434_v51 }
 0x14b   :  { %v1988_v50 = vpop.eup %1987 }
 0x14c   :  { %v1990_v52 = vpop.eup %1989  ;;  %v443_v53 = vmul.f32 %v1988_v50, %v1986_v49 }
 0x14d   :  { %v442_v55 = vmul.f32 %v1990_v52, %v76_v40  ;;  %v1992_v57 = vpop.eup %1991 }
 0x14f   :  { %v2503_v56 = vadd.f32 %v443_v53, %v442_v55 }
 0x151   :  { %1993 = vtanh.f32 %v2503_v56 }
 0x15b   :  { %v1994_v58 = vpop.eup %1993 }
 0x15c   :  { %v446_v59 = vmul.f32 %v1994_v58, %v1992_v57  ;;  %v483_v57 = vrot.slane %v456_v61, %v2494_v54  ;;  %v504_v58 = vrot.slane %v466_v62, %v2494_v54 }
 0x15e   :  { %v513_v60 = vpack.c.bf16 %v446_v59, %v446_v59  ;;  %v511_v59 = vsel %vm139_vm0, %v479_v48, %v500_v38  ;;  %v512_v63 = vsel %vm139_vm0, %v483_v57, %v504_v58 }
 0x160   :  { %547 = vmatmul.mubr.bf16.vlgmr.msra.gmra.mrb[4].mxu0 %v513_v60  ;;  %588 = vmatmul.mubr.bf16.vlgmr.msra.gmra.mrb[4].mxu1 %v513_v60 }
 0x161   :  { %692 = vmatpush1.bf16.msra.mxu0 %v2345_v2  ;;  %733 = vmatpush1.bf16.msra.mxu1 %v2360_v8 }
 0x162   :  { %693 = vmatprep.subr.bf16.mxu0 %v2350_v4  ;;  %734 = vmatprep.subr.bf16.mxu1 %v2370_v11 }
 0x163   :  { %723 = vmatprep.mubr.bf16.mxu0 %v2260_v3  ;;  %764 = vmatprep.mubr.bf16.mxu1 %v2260_v3 }
 0x165   :  { %694 = vmatpush1.bf16.msra.mxu0 %v2353_v5  ;;  %735 = vmatpush1.bf16.msra.mxu1 %v2372_v12 }
 0x166   :  { %695 = vmatprep.subr.bf16.mxu0 %v2356_v6  ;;  %736 = vmatprep.subr.bf16.mxu1 %v2380_v15 }
 0x169   :  { %696 = vmatpush1.bf16.msra.mxu0 %v2363_v9  ;;  %737 = vmatpush1.bf16.msra.mxu1 %v2384_v16 }
 0x16a   :  { %697 = vmatprep.subr.bf16.mxu0 %v2367_v10  ;;  %738 = vmatprep.subr.bf16.mxu1 %v2387_v17 }
 0x16d   :  { %698 = vmatpush1.bf16.msra.mxu0 %v2376_v13  ;;  %739 = vmatpush1.bf16.msra.mxu1 %v2396_v20 }
 0x16e   :  { %699 = vmatprep.subr.bf16.mxu0 %v2378_v14  ;;  %740 = vmatprep.subr.bf16.mxu1 %v2399_v21 }
 0x171   :  { %700 = vmatpush1.bf16.msra.mxu0 %v2390_v18  ;;  %741 = vmatpush1.bf16.msra.mxu1 %v2408_v24 }
 0x172   :  { %701 = vmatprep.subr.bf16.mxu0 %v2393_v19  ;;  %742 = vmatprep.subr.bf16.mxu1 %v2411_v25 }
 0x175   :  { %702 = vmatpush1.bf16.msra.mxu0 %v2401_v22  ;;  %743 = vmatpush1.bf16.msra.mxu1 %v2420_v28 }
 0x176   :  { %703 = vmatprep.subr.bf16.mxu0 %v2404_v23  ;;  %744 = vmatprep.subr.bf16.mxu1 %v2423_v29 }
 0x179   :  { %704 = vmatpush1.bf16.msra.mxu0 %v2414_v26  ;;  %745 = vmatpush1.bf16.msra.mxu1 %v2433_v32 }
 0x17a   :  { %705 = vmatprep.subr.bf16.mxu0 %v2417_v27  ;;  %746 = vmatprep.subr.bf16.mxu1 %v2436_v33 }
 0x17d   :  { %706 = vmatpush1.bf16.msra.mxu0 %v2426_v30  ;;  %747 = vmatpush1.bf16.msra.mxu1 %v2440_v35 }
 0x17e   :  { %868 = vmatprep.subr.bf16.mxu0 %v2343_v1  ;;  %909 = vmatprep.subr.bf16.mxu1 %v2358_v7 }
 0x233   :  { %v548_v42 = vpop.f32.mrb[4].mxu0  ;;  %v589_v43 = vpop.f32.mrb[4].mxu1 }
 0x234   :  { %v596_v44 = vadd.f32 %v548_v42, %v509_v36  ;;  %v550_v45 = vpop.f32.mrb[5].mxu0  ;;  %v591_v47 = vpop.f32.mrb[5].mxu1  ;;  %v598_v60 = vadd.f32 %v589_v43, %v511_v59 }
 0x235   :  { %v597_v49 = vadd.f32 %v550_v45, %v510_v37  ;;  %v552_v40 = vpop.f32.mrb[6].mxu0  ;;  %v593_v50 = vpop.f32.mrb[6].mxu1  ;;  %v599_v0 = vadd.f32 %v591_v47, %v512_v63 }
 0x236   :  { %v1845_v51 = vmul.f32 -1.442695, %v596_v44  ;;  %v553_v52 = vpop.f32.mrb[7].mxu0  ;;  %v594_v53 = vpop.f32.mrb[7].mxu1  ;;  %v1847_v31 = vmul.f32 -1.442695, %v598_v60 }
 0x237   :  { %v1846_v55 = vmul.f32 -1.442695, %v597_v49  ;;  %v643_v52 = vld [vmem:[%s642_s28] ss:$8 sm:$0xf]  ;;  %s1156_s28 = sshra.s32 %s1875_s26, 3 }
 0x238   :  { %1995 = vpow2.f32 %v1845_v51  ;;  %v673_v58 = vrot.slane %v643_v52, %v2482_v41  ;;  %s1915_s10 = sshll.u32 %s1156_s28, 5 }
 0x239   :  { %1997 = vpow2.f32 %v1846_v55  ;;  %v669_v55 = vrot.slane %v643_v52, %v2480_v39  ;;  %s1162_s12 = sadd.s32 %s1915_s10, %s1159_s30 }
 0x23a   :  { %1999 = vtanh.f32 %v599_v0  ;;  %s1163_s14 = scalar_lea.vmem [#allocation7], %s1162_s12 }
 0x23b   :  { %2001 = vpow2.f32 %v1847_v31 }
 0x242   :  { %v1996_v34 = vpop.eup %1995 }
 0x243   :  { %v609_v36 = vadd.f32 1.0, %v1996_v34  ;;  %v1998_v37 = vpop.eup %1997 }
 0x244   :  { %v610_v42 = vadd.f32 1.0, %v1998_v37  ;;  %v2000_v44 = vpop.eup %1999 }
 0x245   :  { %2003 = vrcp.f32 %v609_v36  ;;  %v2002_v61 = vpop.eup %2001 }
 0x246   :  { %2005 = vrcp.f32 %v610_v42  ;;  %v611_v48 = vadd.f32 1.0, %v2002_v61  ;;  %v677_v42 = vrot.slane %v643_v52, %v2488_v46 }
 0x248   :  { %2007 = vrcp.f32 %v611_v48 }
 0x24f   :  { %v2004_v45 = vpop.eup %2003 }
 0x250   :  { %v620_v62 = vmul.f32 %v2004_v45, %v2000_v44  ;;  %v2006_v49 = vpop.eup %2005 }
 0x251   :  { %v619_v43 = vmul.f32 %v2006_v49, %v2503_v56  ;;  %v633_v56 = vld [vmem:[%s632_s27] ss:$8 sm:$0xf]  ;;  %s1878_s27 = sld [smem:[#allocation3 + $0xd]] }
 0x252   :  { %v2008_v47 = vpop.eup %2007  ;;  %v648_v53 = vrot.slane %v633_v56, %v2480_v39  ;;  %v652_v57 = vrot.slane %v633_v56, %v2482_v41  ;;  %v656_v37 = vrot.slane %v633_v56, %v2488_v46 }
 0x253   :  { %v2553_v38 = vadd.f32 %v620_v62, %v619_v43 }
 0x254   :  { %v686_v59 = vsel %vm139_vm0, %v648_v53, %v669_v55  ;;  %v687_v60 = vsel %vm139_vm0, %v652_v57, %v673_v58 }
 0x255   :  { %2009 = vtanh.f32 %v2553_v38 }
 0x257   :  { %s1166_s29 = sshra.s32 %s1878_s27, 3  ;;  %s1169_s4 = sand.u32 7, %s1878_s27 }
 0x258   :  { %s1916_s11 = sshll.u32 %s1166_s29, 5  ;;  %s1513_s27 = sand.u32 7, %s1893_s23 }
 0x259   :  { %s1172_s13 = sadd.s32 %s1916_s11, %s1169_s4 }
 0x25a   :  { %s1173_s15 = scalar_lea.vmem [#allocation7], %s1172_s13 }
 0x25f   :  { %v2010_v40 = vpop.eup %2009 }
 0x260   :  { %v623_v50 = vmul.f32 %v2010_v40, %v2008_v47  ;;  %v660_v47 = vrot.slane %v633_v56, %v2494_v54  ;;  %v681_v40 = vrot.slane %v643_v52, %v2494_v54 }
 0x262   :  { %v690_v51 = vpack.c.bf16 %v623_v50, %v623_v50  ;;  %v688_v50 = vsel %vm139_vm0, %v656_v37, %v677_v42  ;;  %v689_v53 = vsel %vm139_vm0, %v660_v47, %v681_v40 }
 0x264   :  { %724 = vmatmul.mubr.bf16.vlgmr.msra.gmra.mrb[8].mxu0 %v690_v51  ;;  %765 = vmatmul.mubr.bf16.vlgmr.msra.gmra.mrb[8].mxu1 %v690_v51 }
 0x265   :  { %869 = vmatpush1.bf16.msra.mxu0 %v2345_v2  ;;  %910 = vmatpush1.bf16.msra.mxu1 %v2360_v8 }
 0x266   :  { %870 = vmatprep.subr.bf16.mxu0 %v2350_v4  ;;  %911 = vmatprep.subr.bf16.mxu1 %v2370_v11 }
 0x267   :  { %900 = vmatprep.mubr.bf16.mxu0 %v2260_v3  ;;  %941 = vmatprep.mubr.bf16.mxu1 %v2260_v3 }
 0x269   :  { %871 = vmatpush1.bf16.msra.mxu0 %v2353_v5  ;;  %912 = vmatpush1.bf16.msra.mxu1 %v2372_v12 }
 0x26a   :  { %872 = vmatprep.subr.bf16.mxu0 %v2356_v6  ;;  %913 = vmatprep.subr.bf16.mxu1 %v2380_v15 }
 0x26d   :  { %873 = vmatpush1.bf16.msra.mxu0 %v2363_v9  ;;  %914 = vmatpush1.bf16.msra.mxu1 %v2384_v16 }
 0x26e   :  { %874 = vmatprep.subr.bf16.mxu0 %v2367_v10  ;;  %915 = vmatprep.subr.bf16.mxu1 %v2387_v17 }
 0x271   :  { %875 = vmatpush1.bf16.msra.mxu0 %v2376_v13  ;;  %916 = vmatpush1.bf16.msra.mxu1 %v2396_v20 }
 0x272   :  { %876 = vmatprep.subr.bf16.mxu0 %v2378_v14  ;;  %917 = vmatprep.subr.bf16.mxu1 %v2399_v21 }
 0x275   :  { %877 = vmatpush1.bf16.msra.mxu0 %v2390_v18  ;;  %918 = vmatpush1.bf16.msra.mxu1 %v2408_v24 }
 0x276   :  { %878 = vmatprep.subr.bf16.mxu0 %v2393_v19  ;;  %919 = vmatprep.subr.bf16.mxu1 %v2411_v25 }
 0x279   :  { %879 = vmatpush1.bf16.msra.mxu0 %v2401_v22  ;;  %920 = vmatpush1.bf16.msra.mxu1 %v2420_v28 }
 0x27a   :  { %880 = vmatprep.subr.bf16.mxu0 %v2404_v23  ;;  %921 = vmatprep.subr.bf16.mxu1 %v2423_v29 }
 0x27d   :  { %881 = vmatpush1.bf16.msra.mxu0 %v2414_v26  ;;  %922 = vmatpush1.bf16.msra.mxu1 %v2433_v32 }
 0x27e   :  { %882 = vmatprep.subr.bf16.mxu0 %v2417_v27  ;;  %923 = vmatprep.subr.bf16.mxu1 %v2436_v33 }
 0x281   :  { %883 = vmatpush1.bf16.msra.mxu0 %v2426_v30  ;;  %924 = vmatpush1.bf16.msra.mxu1 %v2440_v35 }
 0x282   :  { %1045 = vmatprep.subr.bf16.mxu0 %v2343_v1  ;;  %1086 = vmatprep.subr.bf16.mxu1 %v2358_v7 }
 0x337   :  { %v725_v63 = vpop.f32.mrb[8].mxu0  ;;  %v766_v0 = vpop.f32.mrb[8].mxu1 }
 0x338   :  { %v773_v31 = vadd.f32 %v725_v63, %v686_v59  ;;  %v727_v34 = vpop.f32.mrb[9].mxu0  ;;  %v768_v36 = vpop.f32.mrb[9].mxu1  ;;  %v775_v51 = vadd.f32 %v766_v0, %v688_v50 }
 0x339   :  { %v774_v44 = vadd.f32 %v727_v34, %v687_v60  ;;  %v729_v61 = vpop.f32.mrb[10].mxu0  ;;  %v770_v45 = vpop.f32.mrb[10].mxu1  ;;  %v776_v55 = vadd.f32 %v768_v36, %v689_v53 }
 0x33a   :  { %v1854_v62 = vmul.f32 -1.442695, %v773_v31  ;;  %v730_v49 = vpop.f32.mrb[11].mxu0  ;;  %v771_v48 = vpop.f32.mrb[11].mxu1  ;;  %v1856_v57 = vmul.f32 -1.442695, %v775_v51 }
 0x33b   :  { %v1855_v43 = vmul.f32 -1.442695, %v774_v44 }
 0x33c   :  { %2011 = vpow2.f32 %v1854_v62 }
 0x33d   :  { %2013 = vpow2.f32 %v1855_v43 }
 0x33e   :  { %2015 = vtanh.f32 %v776_v55 }
 0x33f   :  { %2017 = vpow2.f32 %v1856_v57 }
 0x346   :  { %v2012_v58 = vpop.eup %2011 }
 0x347   :  { %v786_v59 = vadd.f32 1.0, %v2012_v58  ;;  %v2014_v60 = vpop.eup %2013 }
 0x348   :  { %v787_v63 = vadd.f32 1.0, %v2014_v60  ;;  %v2016_v31 = vpop.eup %2015 }
 0x349   :  { %2019 = vrcp.f32 %v786_v59  ;;  %v2018_v56 = vpop.eup %2017 }
 0x34a   :  { %2021 = vrcp.f32 %v787_v63  ;;  %v788_v37 = vadd.f32 1.0, %v2018_v56 }
 0x34c   :  { %2023 = vrcp.f32 %v788_v37 }
 0x353   :  { %v2020_v34 = vpop.eup %2019 }
 0x354   :  { %v797_v52 = vmul.f32 %v2020_v34, %v2016_v31  ;;  %v2022_v44 = vpop.eup %2021 }
 0x355   :  { %v796_v0 = vmul.f32 %v2022_v44, %v2553_v38  ;;  %v820_v38 = vld [vmem:[%s819_s16] ss:$8 sm:$0xf]  ;;  %s1333_s16 = sshra.s32 %s1884_s6, 3 }
 0x356   :  { %v2024_v36 = vpop.eup %2023  ;;  %v850_v48 = vrot.slane %v820_v38, %v2482_v41  ;;  %v854_v58 = vrot.slane %v820_v38, %v2488_v46  ;;  %v858_v37 = vrot.slane %v820_v38, %v2494_v54  ;;  %s1917_s2 = sshll.u32 %s1333_s16, 5 }
 0x357   :  { %v2603_v42 = vadd.f32 %v797_v52, %v796_v0  ;;  %s1339_s20 = sadd.s32 %s1917_s2, %s1336_s18 }
 0x358   :  { %s1340_s0 = scalar_lea.vmem [#allocation7], %s1339_s20 }
 0x359   :  { %2025 = vtanh.f32 %v2603_v42 }
 0x363   :  { %v2026_v61 = vpop.eup %2025 }
 0x364   :  { %v800_v45 = vmul.f32 %v2026_v61, %v2024_v36 }
 0x366   :  { %v867_v62 = vpack.c.bf16 %v800_v45, %v800_v45 }
 0x368   :  { %901 = vmatmul.mubr.bf16.vlgmr.msra.gmra.mrb[12].mxu0 %v867_v62  ;;  %942 = vmatmul.mubr.bf16.vlgmr.msra.gmra.mrb[12].mxu1 %v867_v62 }
 0x369   :  { %1046 = vmatpush1.bf16.msra.mxu0 %v2345_v2  ;;  %1087 = vmatpush1.bf16.msra.mxu1 %v2360_v8  ;;  %v810_v2 = vld [vmem:[%s809_s1] ss:$8 sm:$0xf]  ;;  %s1887_s1 = sld [smem:[#allocation3 + $0xe]] }
 0x36a   :  { %1047 = vmatprep.subr.bf16.mxu0 %v2350_v4  ;;  %1088 = vmatprep.subr.bf16.mxu1 %v2370_v11  ;;  %v825_v49 = vrot.slane %v810_v2, %v2480_v39  ;;  %v833_v57 = vrot.slane %v810_v2, %v2488_v46  ;;  %v837_v44 = vrot.slane %v810_v2, %v2494_v54 }
 0x36b   :  { %1077 = vmatprep.mubr.bf16.mxu0 %v2260_v3  ;;  %1118 = vmatprep.mubr.bf16.mxu1 %v2260_v3 }
 0x36c   :  { %v865_v0 = vsel %vm139_vm0, %v833_v57, %v854_v58  ;;  %v866_v61 = vsel %vm139_vm0, %v837_v44, %v858_v37 }
 0x36d   :  { %1048 = vmatpush1.bf16.msra.mxu0 %v2353_v5  ;;  %1089 = vmatpush1.bf16.msra.mxu1 %v2372_v12 }
 0x36e   :  { %1049 = vmatprep.subr.bf16.mxu0 %v2356_v6  ;;  %1090 = vmatprep.subr.bf16.mxu1 %v2380_v15 }
 0x36f   :  { %s1343_s17 = sshra.s32 %s1887_s1, 3  ;;  %s1346_s19 = sand.u32 7, %s1887_s1 }
 0x370   :  { %s1918_s3 = sshll.u32 %s1343_s17, 5  ;;  %s2262_s1 = smov [#allocation11]  }
 0x371   :  { %1050 = vmatpush1.bf16.msra.mxu0 %v2363_v9  ;;  %1091 = vmatpush1.bf16.msra.mxu1 %v2384_v16  ;;  %s1349_s21 = sadd.s32 %s1918_s3, %s1346_s19  ;;  %s1734_s16 = sshll.u32 %s2262_s1, 4  ;;  %s1735_s16 = int_to_ptr.vmem [resolvable:$true] %s1734_s16 }
 0x372   :  { %1051 = vmatprep.subr.bf16.mxu0 %v2367_v10  ;;  %1092 = vmatprep.subr.bf16.mxu1 %v2387_v17  ;;  %s1350_s22 = scalar_lea.vmem [#allocation7], %s1349_s21 }
 0x375   :  { %1052 = vmatpush1.bf16.msra.mxu0 %v2376_v13  ;;  %1093 = vmatpush1.bf16.msra.mxu1 %v2396_v20 }
 0x376   :  { %1053 = vmatprep.subr.bf16.mxu0 %v2378_v14  ;;  %1094 = vmatprep.subr.bf16.mxu1 %v2399_v21 }
 0x379   :  { %1054 = vmatpush1.bf16.msra.mxu0 %v2390_v18  ;;  %1095 = vmatpush1.bf16.msra.mxu1 %v2408_v24 }
 0x37a   :  { %1055 = vmatprep.subr.bf16.mxu0 %v2393_v19  ;;  %1096 = vmatprep.subr.bf16.mxu1 %v2411_v25 }
 0x37d   :  { %1056 = vmatpush1.bf16.msra.mxu0 %v2401_v22  ;;  %1097 = vmatpush1.bf16.msra.mxu1 %v2420_v28 }
 0x37e   :  { %1057 = vmatprep.subr.bf16.mxu0 %v2404_v23  ;;  %1098 = vmatprep.subr.bf16.mxu1 %v2423_v29 }
 0x381   :  { %1058 = vmatpush1.bf16.msra.mxu0 %v2414_v26  ;;  %1099 = vmatpush1.bf16.msra.mxu1 %v2433_v32 }
 0x382   :  { %1059 = vmatprep.subr.bf16.mxu0 %v2417_v27  ;;  %1100 = vmatprep.subr.bf16.mxu1 %v2436_v33 }
 0x385   :  { %1060 = vmatpush1.bf16.msra.mxu0 %v2426_v30  ;;  %1101 = vmatpush1.bf16.msra.mxu1 %v2440_v35 }
 0x386   :  { %1222 = vmatprep.subr.bf16.mxu0 %v2343_v1  ;;  %1263 = vmatprep.subr.bf16.mxu1 %v2358_v7  ;;  %v846_v1 = vrot.slane %v820_v38, %v2480_v39  ;;  %v829_v7 = vrot.slane %v810_v2, %v2482_v41 }
 0x388   :  { %v863_v43 = vsel %vm139_vm0, %v825_v49, %v846_v1  ;;  %v864_v47 = vsel %vm139_vm0, %v829_v7, %v850_v48 }
 0x43b   :  { %v902_v40 = vpop.f32.mrb[12].mxu0  ;;  %v943_v50 = vpop.f32.mrb[12].mxu1 }
 0x43c   :  { %v950_v51 = vadd.f32 %v902_v40, %v863_v43  ;;  %v904_v53 = vpop.f32.mrb[13].mxu0  ;;  %v945_v55 = vpop.f32.mrb[13].mxu1  ;;  %v952_v36 = vadd.f32 %v943_v50, %v865_v0 }
 0x43d   :  { %v951_v59 = vadd.f32 %v904_v53, %v864_v47  ;;  %v906_v60 = vpop.f32.mrb[14].mxu0  ;;  %v947_v63 = vpop.f32.mrb[14].mxu1  ;;  %v953_v45 = vadd.f32 %v945_v55, %v866_v61 }
 0x43e   :  { %v1863_v31 = vmul.f32 -1.442695, %v950_v51  ;;  %v907_v56 = vpop.f32.mrb[15].mxu0  ;;  %v948_v34 = vpop.f32.mrb[15].mxu1  ;;  %v1865_v62 = vmul.f32 -1.442695, %v952_v36 }
 0x43f   :  { %v1864_v52 = vmul.f32 -1.442695, %v951_v59  ;;  %v2656_v60 = vld [vmem:[#allocation8] ss:$16 sps:$4 sm:$0xff]  }
 0x440   :  { %2027 = vpow2.f32 %v1863_v31 }
 0x441   :  { %2029 = vpow2.f32 %v1864_v52 }
 0x442   :  { %2031 = vtanh.f32 %v953_v45 }
 0x443   :  { %2033 = vpow2.f32 %v1865_v62 }
 0x44a   :  { %v2028_v49 = vpop.eup %2027 }
 0x44b   :  { %v963_v1 = vadd.f32 1.0, %v2028_v49  ;;  %v2030_v7 = vpop.eup %2029 }
 0x44c   :  { %v964_v48 = vadd.f32 1.0, %v2030_v7  ;;  %v2032_v43 = vpop.eup %2031 }
 0x44d   :  { %2035 = vrcp.f32 %v963_v1  ;;  %v2034_v2 = vpop.eup %2033 }
 0x44e   :  { %2037 = vrcp.f32 %v964_v48  ;;  %v965_v51 = vadd.f32 1.0, %v2034_v2  ;;  %v2713_v2 = vld [vmem:[#allocation8 + $0x8] ss:$16 sps:$4 sm:$0xff]  }
 0x450   :  { %2039 = vrcp.f32 %v965_v51  ;;  %v2727_v51 = vld [vmem:[#allocation8 + $0x28] ss:$16 sps:$4 sm:$0xff]  }
 0x457   :  { %v2036_v47 = vpop.eup %2035 }
 0x458   :  { %v974_v38 = vmul.f32 %v2036_v47, %v2032_v43  ;;  %v2038_v40 = vpop.eup %2037  ;;  %v2716_v47 = vld [vmem:[#allocation8 + $0x24] ss:$16 sps:$4 sm:$0xff]  }
 0x459   :  { %v973_v50 = vmul.f32 %v2038_v40, %v2603_v42  ;;  %v2724_v40 = vld [vmem:[#allocation8 + $0x20] ss:$16 sps:$4 sm:$0xff]  }
 0x45a   :  { %v2040_v55 = vpop.eup %2039 }
 0x45b   :  { %v2653_v53 = vadd.f32 %v974_v38, %v973_v50  ;;  %v2719_v38 = vld [vmem:[#allocation8 + $0x2c] ss:$16 sps:$4 sm:$0xff]   ;;  %v2730_v50 = vld [vmem:[#allocation8 + $0x44] ss:$16 sps:$4 sm:$0xff]  }
 0x45d   :  { %2041 = vtanh.f32 %v2653_v53 }
 0x467   :  { %v2042_v57 = vpop.eup %2041 }
 0x468   :  { %v977_v58 = vmul.f32 %v2042_v57, %v2040_v55  ;;  %v2736_v55 = vld [vmem:[#allocation8 + $0x40] ss:$16 sps:$4 sm:$0xff]   ;;  %v2739_v57 = vld [vmem:[#allocation8 + $0x48] ss:$16 sps:$4 sm:$0xff]  }
 0x46a   :  { %v1044_v59 = vpack.c.bf16 %v977_v58, %v977_v58  ;;  %v2742_v58 = vld [vmem:[#allocation8 + $0x64] ss:$16 sps:$4 sm:$0xff]  }
 0x46c   :  { %1078 = vmatmul.mubr.bf16.vlgmr.msra.gmra.mrb[16].mxu0 %v1044_v59  ;;  %1119 = vmatmul.mubr.bf16.vlgmr.msra.gmra.mrb[16].mxu1 %v1044_v59  ;;  %v2745_v59 = vld [vmem:[#allocation8 + $0x6c] ss:$16 sps:$4 sm:$0xff]  }
 0x46d   :  { %1223 = vmatpush1.bf16.msra.mxu0 %v2656_v60  ;;  %1264 = vmatpush1.bf16.msra.mxu1 %v2360_v8  ;;  %v997_v8 = vld [vmem:[%s996_s25] ss:$8 sm:$0xf]  ;;  %s1510_s25 = sshra.s32 %s1893_s23, 3 }
 0x46e   :  { %1224 = vmatprep.subr.bf16.mxu0 %v2350_v4  ;;  %1265 = vmatprep.subr.bf16.mxu1 %v2370_v11  ;;  %v2690_v4 = vld [vmem:[#allocation8 + $0x4] ss:$16 sps:$4 sm:$0xff]   ;;  %s1919_s28 = sshll.u32 %s1510_s25, 5 }
 0x46f   :  { %1254 = vmatprep.mubr.bf16.mxu0 %v2260_v3  ;;  %1295 = vmatprep.mubr.bf16.mxu1 %v2260_v3  ;;  %s1516_s10 = sadd.s32 %s1919_s28, %s1513_s27 }
 0x470   :  { %s1517_s11 = scalar_lea.vmem [#allocation7], %s1516_s10 }
 0x471   :  { %1225 = vmatpush1.bf16.msra.mxu0 %v2353_v5  ;;  %1266 = vmatpush1.bf16.msra.mxu1 %v2372_v12  ;;  %v2693_v5 = vld [vmem:[#allocation8 + $0xc] ss:$16 sps:$4 sm:$0xff]   ;;  %v1027_v12 = vrot.slane %v997_v8, %v2482_v41 }
 0x472   :  { %1226 = vmatprep.subr.bf16.mxu0 %v2356_v6  ;;  %1267 = vmatprep.subr.bf16.mxu1 %v2380_v15  ;;  %v987_v6 = vld [vmem:[%s986_s24] ss:$8 sm:$0xf]  ;;  %s1896_s24 = sld [smem:[#allocation3 + $0xf]] }
 0x473   :  { %v1006_v11 = vrot.slane %v987_v6, %v2482_v41 }
 0x475   :  { %1227 = vmatpush1.bf16.msra.mxu0 %v2363_v9  ;;  %1268 = vmatpush1.bf16.msra.mxu1 %v2384_v16  ;;  %v1002_v9 = vrot.slane %v987_v6, %v2480_v39 }
 0x476   :  { %1228 = vmatprep.subr.bf16.mxu0 %v2367_v10  ;;  %1269 = vmatprep.subr.bf16.mxu1 %v2387_v17  ;;  %v1023_v10 = vrot.slane %v997_v8, %v2480_v39 }
 0x478   :  { %s1520_s26 = sshra.s32 %s1896_s24, 3  ;;  %s1523_s29 = sand.u32 7, %s1896_s24 }
 0x479   :  { %1229 = vmatpush1.bf16.msra.mxu0 %v2376_v13  ;;  %1270 = vmatpush1.bf16.msra.mxu1 %v2396_v20  ;;  %v1040_v13 = vsel %vm139_vm0, %v1002_v9, %v1023_v10  ;;  %v1010_v20 = vrot.slane %v987_v6, %v2488_v46  ;;  %v2754_v9 = vld [vmem:[#allocation8 + $0x84] ss:$16 sps:$4 sm:$0xff]   ;;  %v2757_v10 = vld [vmem:[#allocation8 + $0x8c] ss:$16 sps:$4 sm:$0xff]   ;;  %s1920_s30 = sshll.u32 %s1520_s26, 5 }
 0x47a   :  { %1230 = vmatprep.subr.bf16.mxu0 %v2378_v14  ;;  %1271 = vmatprep.subr.bf16.mxu1 %v2399_v21  ;;  %v1041_v14 = vsel %vm139_vm0, %v1006_v11, %v1027_v12  ;;  %v1031_v21 = vrot.slane %v997_v8, %v2488_v46  ;;  %v2760_v11 = vld [vmem:[#allocation8 + $0x80] ss:$16 sps:$4 sm:$0xff]   ;;  %v2763_v12 = vld [vmem:[#allocation8 + $0x88] ss:$16 sps:$4 sm:$0xff]   ;;  %s1526_s4 = sadd.s32 %s1920_s30, %s1523_s29 }
 0x47b   :  { %s1527_s12 = scalar_lea.vmem [#allocation7], %s1526_s4 }
 0x47d   :  { %1231 = vmatpush1.bf16.msra.mxu0 %v2390_v18  ;;  %1272 = vmatpush1.bf16.msra.mxu1 %v2408_v24 }
 0x47e   :  { %1232 = vmatprep.subr.bf16.mxu0 %v2393_v19  ;;  %1273 = vmatprep.subr.bf16.mxu1 %v2411_v25 }
 0x481   :  { %1233 = vmatpush1.bf16.msra.mxu0 %v2401_v22  ;;  %1274 = vmatpush1.bf16.msra.mxu1 %v2420_v28 }
 0x482   :  { %1234 = vmatprep.subr.bf16.mxu0 %v2404_v23  ;;  %1275 = vmatprep.subr.bf16.mxu1 %v2423_v29  ;;  %v1014_v29 = vrot.slane %v987_v6, %v2494_v54  ;;  %v2748_v6 = vld [vmem:[#allocation8 + $0x60] ss:$16 sps:$4 sm:$0xff]  }
 0x485   :  { %1235 = vmatpush1.bf16.msra.mxu0 %v2414_v26  ;;  %1276 = vmatpush1.bf16.msra.mxu1 %v2433_v32  ;;  %v1042_v32 = vsel %vm139_vm0, %v1010_v20, %v1031_v21  ;;  %v2787_v20 = vld [vmem:[#allocation8 + $0xc8] ss:$16 sps:$4 sm:$0xff]   ;;  %v2790_v21 = vld [vmem:[#allocation8 + $0xe4] ss:$16 sps:$4 sm:$0xff]  }
 0x486   :  { %1236 = vmatprep.subr.bf16.mxu0 %v2417_v27  ;;  %1277 = vmatprep.subr.bf16.mxu1 %v2436_v33 }
 0x489   :  { %1237 = vmatpush1.bf16.msra.mxu0 %v2426_v30  ;;  %1278 = vmatpush1.bf16.msra.mxu1 %v2440_v35  ;;  %v1035_v30 = vrot.slane %v997_v8, %v2494_v54  ;;  %v2751_v8 = vld [vmem:[#allocation8 + $0x68] ss:$16 sps:$4 sm:$0xff]  }
 0x48a   :  { %1399 = vmatprep.subr.bf16.mxu0 %v2690_v4  ;;  %1440 = vmatprep.subr.bf16.mxu1 %v2693_v5 }
 0x48b   :  { %v1043_v35 = vsel %vm139_vm0, %v1014_v29, %v1035_v30 }
 0x53f   :  { %v1079_v15 = vpop.f32.mrb[16].mxu0  ;;  %v1120_v16 = vpop.f32.mrb[16].mxu1 }
 0x540   :  { %v1127_v17 = vadd.f32 %v1079_v15, %v1040_v13  ;;  %v1081_v18 = vpop.f32.mrb[17].mxu0  ;;  %v1122_v19 = vpop.f32.mrb[17].mxu1  ;;  %v1129_v33 = vadd.f32 %v1120_v16, %v1042_v32  ;;  %v2766_v13 = vld [vmem:[#allocation8 + $0xa4] ss:$16 sps:$4 sm:$0xff]   ;;  %v2772_v15 = vld [vmem:[#allocation8 + $0xa0] ss:$16 sps:$4 sm:$0xff]  }
 0x541   :  { %v1128_v22 = vadd.f32 %v1081_v18, %v1041_v14  ;;  %v1083_v23 = vpop.f32.mrb[18].mxu0  ;;  %v1124_v24 = vpop.f32.mrb[18].mxu1  ;;  %v1130_v42 = vadd.f32 %v1122_v19, %v1043_v35  ;;  %v2769_v14 = vld [vmem:[#allocation8 + $0xac] ss:$16 sps:$4 sm:$0xff]   ;;  %v2775_v16 = vld [vmem:[#allocation8 + $0xa8] ss:$16 sps:$4 sm:$0xff]  }
 0x542   :  { %v1872_v25 = vmul.f32 -1.442695, %v1127_v17  ;;  %v1084_v26 = vpop.f32.mrb[19].mxu0  ;;  %v1125_v27 = vpop.f32.mrb[19].mxu1  ;;  %v1874_v63 = vmul.f32 -1.442695, %v1129_v33 }
 0x543   :  { %v1873_v28 = vmul.f32 -1.442695, %v1128_v22  ;;  %v2778_v17 = vld [vmem:[#allocation8 + $0xc4] ss:$16 sps:$4 sm:$0xff]   ;;  %v2781_v18 = vld [vmem:[#allocation8 + $0xcc] ss:$16 sps:$4 sm:$0xff]  }
 0x544   :  { %2043 = vpow2.f32 %v1872_v25  ;;  %v2784_v19 = vld [vmem:[#allocation8 + $0xc0] ss:$16 sps:$4 sm:$0xff]   ;;  %v2793_v22 = vld [vmem:[#allocation8 + $0xec] ss:$16 sps:$4 sm:$0xff]   ;;  %v2799_v24 = vld [vmem:[#allocation8 + $0xe8] ss:$16 sps:$4 sm:$0xff]  }
 0x545   :  { %2045 = vpow2.f32 %v1873_v28  ;;  %v2796_v23 = vld [vmem:[#allocation8 + $0xe0] ss:$16 sps:$4 sm:$0xff]   ;;  %v1164_v25 = vld [vmem:[%s1163_s14] ss:$8 sm:$0xf] }
 0x546   :  { %2047 = vtanh.f32 %v1130_v42  ;;  %v1174_v26 = vld [vmem:[%s1173_s15] ss:$8 sm:$0xf]  ;;  %v1179_v27 = vrot.slane %v1164_v25, %v2480_v39  ;;  %s2261_s15 = smov [#allocation10]  }
 0x547   :  { %2049 = vpow2.f32 %v1874_v63  ;;  %v1204_v28 = vrot.slane %v1174_v26, %v2482_v41  ;;  %s1724_s6 = sshll.u32 %s2261_s15, 4  ;;  %s1725_s6 = int_to_ptr.vmem [resolvable:$true] %s1724_s6 }
 0x548   :  { %s2199_s17 = scalar_lea.vmem %s1725_s6, 32  ;;  %p2204_p8 = scmp.lt.s32.totalorder %s1725_s6, %s1725_s6 }
 0x549   :  { %p2200_p7 = scmp.ne.s32.totalorder %s1725_s6, %s2199_s17  ;;  %p2205_p9 = scmp.lt.s32.totalorder %s2199_s17, %s2199_s17 }
 0x54b   :  { %p2206_p10 = por %p2205_p9, %p2204_p8 }
 0x54d   :  { %p2207_p11 = pnand %p2206_p10, %p2200_p7 }
 0x54e   :  { %v2044_v31 = vpop.eup %2043 }
 0x54f   :  { %v1140_v56 = vadd.f32 1.0, %v2044_v31  ;;  %v2046_v34 = vpop.eup %2045  ;;  %v1187_v31 = vrot.slane %v1164_v25, %v2488_v46 }
 0x550   :  { %v1141_v52 = vadd.f32 1.0, %v2046_v34  ;;  %v2048_v44 = vpop.eup %2047 }
 0x551   :  { %2051 = vrcp.f32 %v1140_v56  ;;  %v2050_v37 = vpop.eup %2049  ;;  %v1208_v56 = vrot.slane %v1174_v26, %v2488_v46 }
 0x552   :  { %2053 = vrcp.f32 %v1141_v52  ;;  %v1142_v45 = vadd.f32 1.0, %v2050_v37 }
 0x554   :  { %2055 = vrcp.f32 %v1142_v45  ;;  %v1191_v45 = vrot.slane %v1164_v25, %v2494_v54 }
 0x55b   :  { %v2052_v0 = vpop.eup %2051 }
 0x55c   :  { %v1151_v36 = vmul.f32 %v2052_v0, %v2048_v44  ;;  %v2054_v61 = vpop.eup %2053 }
 0x55d   :  { %v1150_v62 = vmul.f32 %v2054_v61, %v2653_v53  ;;  %v2733_v53 = vld [vmem:[#allocation8 + $0x4c] ss:$16 sps:$4 sm:$0xff]  }
 0x55e   :  { %v2056_v1 = vpop.eup %2055 }
 0x55f   :  { %v2709_v49 = vadd.f32 %v1151_v36, %v1150_v62  ;;  %v1212_v62 = vrot.slane %v1174_v26, %v2494_v54 }
 0x561   :  { %2057 = vtanh.f32 %v2709_v49 }
 0x56b   :  { %v2058_v7 = vpop.eup %2057 }
 0x56c   :  { %v1154_v48 = vmul.f32 %v2058_v7, %v2056_v1  ;;  %v1219_v1 = vsel %vm139_vm0, %v1187_v31, %v1208_v56 }
 0x56e   :  { %v1221_v43 = vpack.c.bf16 %v1154_v48, %v1154_v48  ;;  %v1220_v48 = vsel %vm139_vm0, %v1191_v45, %v1212_v62 }
 0x570   :  { %1255 = vmatmul.mubr.bf16.vlgmr.msra.gmra.mrb[20].mxu0 %v1221_v43  ;;  %1296 = vmatmul.mubr.bf16.vlgmr.msra.gmra.mrb[20].mxu1 %v1221_v43 }
 0x571   :  { %1400 = vmatpush1.bf16.msra.mxu0 %v2656_v60  ;;  %1441 = vmatpush1.bf16.msra.mxu1 %v2713_v2 }
 0x572   :  { %1401 = vmatprep.subr.bf16.mxu0 %v2716_v47  ;;  %1442 = vmatprep.subr.bf16.mxu1 %v2719_v38 }
 0x573   :  { %1431 = vmatprep.mubr.bf16.mxu0 %v2260_v3  ;;  %1472 = vmatprep.mubr.bf16.mxu1 %v2260_v3 }
 0x575   :  { %1402 = vmatpush1.bf16.msra.mxu0 %v2724_v40  ;;  %1443 = vmatpush1.bf16.msra.mxu1 %v2727_v51 }
 0x576   :  { %1403 = vmatprep.subr.bf16.mxu0 %v2730_v50  ;;  %1444 = vmatprep.subr.bf16.mxu1 %v2733_v53 }
 0x579   :  { %1404 = vmatpush1.bf16.msra.mxu0 %v2736_v55  ;;  %1445 = vmatpush1.bf16.msra.mxu1 %v2739_v57 }
 0x57a   :  { %1405 = vmatprep.subr.bf16.mxu0 %v2742_v58  ;;  %1446 = vmatprep.subr.bf16.mxu1 %v2745_v59 }
 0x57d   :  { %1406 = vmatpush1.bf16.msra.mxu0 %v2748_v6  ;;  %1447 = vmatpush1.bf16.msra.mxu1 %v2751_v8 }
 0x57e   :  { %1407 = vmatprep.subr.bf16.mxu0 %v2754_v9  ;;  %1448 = vmatprep.subr.bf16.mxu1 %v2757_v10 }
 0x581   :  { %1408 = vmatpush1.bf16.msra.mxu0 %v2760_v11  ;;  %1449 = vmatpush1.bf16.msra.mxu1 %v2763_v12 }
 0x582   :  { %1409 = vmatprep.subr.bf16.mxu0 %v2766_v13  ;;  %1450 = vmatprep.subr.bf16.mxu1 %v2769_v14 }
 0x585   :  { %1410 = vmatpush1.bf16.msra.mxu0 %v2772_v15  ;;  %1451 = vmatpush1.bf16.msra.mxu1 %v2775_v16 }
 0x586   :  { %1411 = vmatprep.subr.bf16.mxu0 %v2778_v17  ;;  %1452 = vmatprep.subr.bf16.mxu1 %v2781_v18 }
 0x589   :  { %1412 = vmatpush1.bf16.msra.mxu0 %v2784_v19  ;;  %1453 = vmatpush1.bf16.msra.mxu1 %v2787_v20 }
 0x58a   :  { %1413 = vmatprep.subr.bf16.mxu0 %v2790_v21  ;;  %1454 = vmatprep.subr.bf16.mxu1 %v2793_v22 }
 0x58d   :  { %1414 = vmatpush1.bf16.msra.mxu0 %v2796_v23  ;;  %1455 = vmatpush1.bf16.msra.mxu1 %v2799_v24 }
 0x58e   :  { %1576 = vmatprep.subr.bf16.mxu0 %v2690_v4  ;;  %1617 = vmatprep.subr.bf16.mxu1 %v2693_v5  ;;  %v1200_v4 = vrot.slane %v1174_v26, %v2480_v39  ;;  %v1183_v5 = vrot.slane %v1164_v25, %v2482_v41 }
 0x590   :  { %v1217_v29 = vsel %vm139_vm0, %v1179_v27, %v1200_v4  ;;  %v1218_v30 = vsel %vm139_vm0, %v1183_v5, %v1204_v28 }
 0x643   :  { %v1256_v32 = vpop.f32.mrb[20].mxu0  ;;  %v1297_v33 = vpop.f32.mrb[20].mxu1 }
 0x644   :  { %v1304_v35 = vadd.f32 %v1256_v32, %v1217_v29  ;;  %v1258_v42 = vpop.f32.mrb[21].mxu0  ;;  %v1299_v63 = vpop.f32.mrb[21].mxu1  ;;  %v1306_v7 = vadd.f32 %v1297_v33, %v1219_v1 }
 0x645   :  { %v1305_v34 = vadd.f32 %v1258_v42, %v1218_v30  ;;  %v1260_v52 = vpop.f32.mrb[22].mxu0  ;;  %v1301_v44 = vpop.f32.mrb[22].mxu1  ;;  %v1307_v43 = vadd.f32 %v1299_v63, %v1220_v48 }
 0x646   :  { %v1881_v37 = vmul.f32 -1.442695, %v1304_v35  ;;  %v1261_v0 = vpop.f32.mrb[23].mxu0  ;;  %v1302_v36 = vpop.f32.mrb[23].mxu1  ;;  %v1883_v27 = vmul.f32 -1.442695, %v1306_v7 }
 0x647   :  { %v1882_v61 = vmul.f32 -1.442695, %v1305_v34 }
 0x648   :  { %2059 = vpow2.f32 %v1881_v37 }
 0x649   :  { %2061 = vpow2.f32 %v1882_v61 }
 0x64a   :  { %2063 = vtanh.f32 %v1307_v43 }
 0x64b   :  { %2065 = vpow2.f32 %v1883_v27 }
 0x652   :  { %v2060_v4 = vpop.eup %2059 }
 0x653   :  { %v1317_v5 = vadd.f32 1.0, %v2060_v4  ;;  %v2062_v28 = vpop.eup %2061 }
 0x654   :  { %v1318_v29 = vadd.f32 1.0, %v2062_v28  ;;  %v2064_v30 = vpop.eup %2063  ;;  %v1528_v28 = vld [vmem:[%s1527_s12] ss:$8 sm:$0xf] }
 0x655   :  { %2067 = vrcp.f32 %v1317_v5  ;;  %v2066_v25 = vpop.eup %2065  ;;  %v1518_v5 = vld [vmem:[%s1517_s11] ss:$8 sm:$0xf] }
 0x656   :  { %2069 = vrcp.f32 %v1318_v29  ;;  %v1319_v42 = vadd.f32 1.0, %v2066_v25  ;;  %v1533_v29 = vrot.slane %v1518_v5, %v2480_v39  ;;  %v1537_v25 = vrot.slane %v1518_v5, %v2482_v41 }
 0x658   :  { %2071 = vrcp.f32 %v1319_v42 }
 0x65f   :  { %v2068_v32 = vpop.eup %2067 }
 0x660   :  { %v1328_v26 = vmul.f32 %v2068_v32, %v2064_v30  ;;  %v2070_v35 = vpop.eup %2069  ;;  %v1554_v30 = vrot.slane %v1528_v28, %v2480_v39  ;;  %v1558_v32 = vrot.slane %v1528_v28, %v2482_v41 }
 0x661   :  { %v1327_v33 = vmul.f32 %v2070_v35, %v2709_v49 }
 0x662   :  { %v2072_v63 = vpop.eup %2071  ;;  %v1572_v35 = vsel %vm139_vm0, %v1537_v25, %v1558_v32 }
 0x663   :  { %v2817_v31 = vadd.f32 %v1328_v26, %v1327_v33  ;;  %v1571_v26 = vsel %vm139_vm0, %v1533_v29, %v1554_v30 }
 0x665   :  { %2073 = vtanh.f32 %v2817_v31 }
 0x66f   :  { %v2074_v56 = vpop.eup %2073 }
 0x670   :  { %v1331_v34 = vmul.f32 %v2074_v56, %v2072_v63 }
 0x672   :  { %v1398_v52 = vpack.c.bf16 %v1331_v34, %v1331_v34  ;;  %v1541_v34 = vrot.slane %v1518_v5, %v2488_v46 }
 0x674   :  { %1432 = vmatmul.mubr.bf16.vlgmr.msra.gmra.mrb[24].mxu0 %v1398_v52  ;;  %1473 = vmatmul.mubr.bf16.vlgmr.msra.gmra.mrb[24].mxu1 %v1398_v52  ;;  %v1562_v52 = vrot.slane %v1528_v28, %v2488_v46 }
 0x675   :  { %1577 = vmatpush1.bf16.msra.mxu0 %v2656_v60  ;;  %1618 = vmatpush1.bf16.msra.mxu1 %v2713_v2  ;;  %v1351_v60 = vld [vmem:[%s1350_s22] ss:$8 sm:$0xf] }
 0x676   :  { %1578 = vmatprep.subr.bf16.mxu0 %v2716_v47  ;;  %1619 = vmatprep.subr.bf16.mxu1 %v2719_v38  ;;  %v1377_v2 = vrot.slane %v1351_v60, %v2480_v39  ;;  %v1381_v38 = vrot.slane %v1351_v60, %v2482_v41 }
 0x677   :  { %1608 = vmatprep.mubr.bf16.mxu0 %v2260_v3  ;;  %1649 = vmatprep.mubr.bf16.mxu1 %v2260_v3  ;;  %v1341_v3 = vld [vmem:[%s1340_s0] ss:$8 sm:$0xf] }
 0x678   :  { %v1356_v49 = vrot.slane %v1341_v3, %v2480_v39  ;;  %v1360_v47 = vrot.slane %v1341_v3, %v2482_v41 }
 0x679   :  { %1579 = vmatpush1.bf16.msra.mxu0 %v2724_v40  ;;  %1620 = vmatpush1.bf16.msra.mxu1 %v2727_v51 }
 0x67a   :  { %1580 = vmatprep.subr.bf16.mxu0 %v2730_v50  ;;  %1621 = vmatprep.subr.bf16.mxu1 %v2733_v53  ;;  %v1394_v40 = vsel %vm139_vm0, %v1356_v49, %v1377_v2  ;;  %v1395_v51 = vsel %vm139_vm0, %v1360_v47, %v1381_v38  ;;  %v1545_v38 = vrot.slane %v1518_v5, %v2494_v54 }
 0x67d   :  { %1581 = vmatpush1.bf16.msra.mxu0 %v2736_v55  ;;  %1622 = vmatpush1.bf16.msra.mxu1 %v2739_v57 }
 0x67e   :  { %1582 = vmatprep.subr.bf16.mxu0 %v2742_v58  ;;  %1623 = vmatprep.subr.bf16.mxu1 %v2745_v59  ;;  %v1364_v59 = vrot.slane %v1341_v3, %v2488_v46 }
 0x681   :  { %1583 = vmatpush1.bf16.msra.mxu0 %v2748_v6  ;;  %1624 = vmatpush1.bf16.msra.mxu1 %v2751_v8  ;;  %v1385_v6 = vrot.slane %v1351_v60, %v2488_v46 }
 0x682   :  { %1584 = vmatprep.subr.bf16.mxu0 %v2754_v9  ;;  %1625 = vmatprep.subr.bf16.mxu1 %v2757_v10 }
 0x685   :  { %1585 = vmatpush1.bf16.msra.mxu0 %v2760_v11  ;;  %1626 = vmatpush1.bf16.msra.mxu1 %v2763_v12 }
 0x686   :  { %1586 = vmatprep.subr.bf16.mxu0 %v2766_v13  ;;  %1627 = vmatprep.subr.bf16.mxu1 %v2769_v14 }
 0x689   :  { %1587 = vmatpush1.bf16.msra.mxu0 %v2772_v15  ;;  %1628 = vmatpush1.bf16.msra.mxu1 %v2775_v16  ;;  %v1368_v15 = vrot.slane %v1341_v3, %v2494_v54  ;;  %v1389_v16 = vrot.slane %v1351_v60, %v2494_v54 }
 0x68a   :  { %1588 = vmatprep.subr.bf16.mxu0 %v2778_v17  ;;  %1629 = vmatprep.subr.bf16.mxu1 %v2781_v18  ;;  %v1396_v17 = vsel %vm139_vm0, %v1364_v59, %v1385_v6 }
 0x68d   :  { %1589 = vmatpush1.bf16.msra.mxu0 %v2784_v19  ;;  %1630 = vmatpush1.bf16.msra.mxu1 %v2787_v20  ;;  %v1397_v19 = vsel %vm139_vm0, %v1368_v15, %v1389_v16 }
 0x68e   :  { %1590 = vmatprep.subr.bf16.mxu0 %v2790_v21  ;;  %1631 = vmatprep.subr.bf16.mxu1 %v2793_v22 }
 0x691   :  { %1591 = vmatpush1.bf16.msra.mxu0 %v2796_v23  ;;  %1632 = vmatpush1.bf16.msra.mxu1 %v2799_v24 }
 0x747   :  { %v1433_v50 = vpop.f32.mrb[24].mxu0  ;;  %v1474_v53 = vpop.f32.mrb[24].mxu1 }
 0x748   :  { %v1481_v55 = vadd.f32 %v1433_v50, %v1394_v40  ;;  %v1435_v57 = vpop.f32.mrb[25].mxu0  ;;  %v1476_v58 = vpop.f32.mrb[25].mxu1  ;;  %v1483_v18 = vadd.f32 %v1474_v53, %v1396_v17  ;;  %v1566_v40 = vrot.slane %v1528_v28, %v2494_v54  ;;  %v1902_v17 = vld [vmem:[%s2916_s5] ss:$0 sm:$0xff] }
 0x749   :  { %v1482_v8 = vadd.f32 %v1435_v57, %v1395_v51  ;;  %v1437_v9 = vpop.f32.mrb[26].mxu0  ;;  %v1478_v10 = vpop.f32.mrb[26].mxu1  ;;  %v1484_v20 = vadd.f32 %v1476_v58, %v1397_v19  ;;  %v1573_v51 = vsel %vm139_vm0, %v1541_v34, %v1562_v52 }
 0x74a   :  { %v1890_v11 = vmul.f32 -1.442695, %v1481_v55  ;;  %v1438_v12 = vpop.f32.mrb[27].mxu0  ;;  %v1479_v13 = vpop.f32.mrb[27].mxu1  ;;  %v1892_v21 = vmul.f32 -1.442695, %v1483_v18  ;;  %v1574_v53 = vsel %vm139_vm0, %v1545_v38, %v1566_v40 }
 0x74b   :  { %v1891_v14 = vmul.f32 -1.442695, %v1482_v8 }
 0x74c   :  { %2075 = vpow2.f32 %v1890_v11 }
 0x74d   :  { %2077 = vpow2.f32 %v1891_v14 }
 0x74e   :  { %2079 = vtanh.f32 %v1484_v20 }
 0x74f   :  { %2081 = vpow2.f32 %v1892_v21 }
 0x756   :  { %v2076_v22 = vpop.eup %2075 }
 0x757   :  { %v1494_v23 = vadd.f32 1.0, %v2076_v22  ;;  %v2078_v24 = vpop.eup %2077 }
 0x758   :  { %v1495_v44 = vadd.f32 1.0, %v2078_v24  ;;  %v2080_v37 = vpop.eup %2079 }
 0x759   :  { %2083 = vrcp.f32 %v1494_v23  ;;  %v2082_v0 = vpop.eup %2081 }
 0x75a   :  { %2085 = vrcp.f32 %v1495_v44  ;;  %v1496_v62 = vadd.f32 1.0, %v2082_v0 }
 0x75c   :  { %2087 = vrcp.f32 %v1496_v62 }
 0x763   :  { %v2084_v36 = vpop.eup %2083 }
 0x764   :  { %v1505_v61 = vmul.f32 %v2084_v36, %v2080_v37  ;;  %v2086_v45 = vpop.eup %2085 }
 0x765   :  { %v1504_v1 = vmul.f32 %v2086_v45, %v2817_v31 }
 0x766   :  { %v2088_v48 = vpop.eup %2087 }
 0x767   :  { %v2865_v7 = vadd.f32 %v1505_v61, %v1504_v1 }
 0x769   :  { %2089 = vtanh.f32 %v2865_v7 }
 0x773   :  { %v2090_v43 = vpop.eup %2089 }
 0x774   :  { %v1508_v27 = vmul.f32 %v2090_v43, %v2088_v48 }
 0x776   :  { %v1575_v4 = vpack.c.bf16 %v1508_v27, %v1508_v27 }
 0x778   :  { %1609 = vmatmul.mubr.bf16.vlgmr.msra.gmra.mrb[28].mxu0 %v1575_v4  ;;  %1650 = vmatmul.mubr.bf16.vlgmr.msra.gmra.mrb[28].mxu1 %v1575_v4 }
 0x84b   :  { %v1610_v42 = vpop.f32.mrb[28].mxu0  ;;  %v1651_v33 = vpop.f32.mrb[28].mxu1 }
 0x84c   :  { %v1658_v31 = vadd.f32 %v1610_v42, %v1571_v26  ;;  %v1612_v63 = vpop.f32.mrb[29].mxu0  ;;  %v1653_v56 = vpop.f32.mrb[29].mxu1  ;;  %v1660_v50 = vadd.f32 %v1651_v33, %v1573_v51 }
 0x84d   :  { %v1659_v3 = vadd.f32 %v1612_v63, %v1572_v35  ;;  %v1614_v60 = vpop.f32.mrb[30].mxu0  ;;  %v1655_v39 = vpop.f32.mrb[30].mxu1  ;;  %v1661_v55 = vadd.f32 %v1653_v56, %v1574_v53 }
 0x84e   :  { %v1899_v49 = vmul.f32 -1.442695, %v1658_v31  ;;  %v1615_v2 = vpop.f32.mrb[31].mxu0  ;;  %v1656_v47 = vpop.f32.mrb[31].mxu1  ;;  %v1901_v46 = vmul.f32 -1.442695, %v1660_v50 }
 0x84f   :  { %v1900_v41 = vmul.f32 -1.442695, %v1659_v3 }
 0x850   :  { %2091 = vpow2.f32 %v1899_v49 }
 0x851   :  { %2093 = vpow2.f32 %v1900_v41 }
 0x852   :  { %2095 = vtanh.f32 %v1661_v55 }
 0x853   :  { %2097 = vpow2.f32 %v1901_v46 }
 0x85a   :  { %v2092_v57 = vpop.eup %2091 }
 0x85b   :  { %v1671_v58 = vadd.f32 1.0, %v2092_v57  ;;  %v2094_v59 = vpop.eup %2093 }
 0x85c   :  { %v1672_v6 = vadd.f32 1.0, %v2094_v59  ;;  %v2096_v8 = vpop.eup %2095 }
 0x85d   :  { %2099 = vrcp.f32 %v1671_v58  ;;  %v2098_v9 = vpop.eup %2097 }
 0x85e   :  { %2101 = vrcp.f32 %v1672_v6  ;;  %v1673_v12 = vadd.f32 1.0, %v2098_v9 }
 0x860   :  { %2103 = vrcp.f32 %v1673_v12 }
 0x867   :  { %v2100_v10 = vpop.eup %2099 }
 0x868   :  { %v1682_v54 = vmul.f32 %v2100_v10, %v2096_v8  ;;  %v2102_v11 = vpop.eup %2101 }
 0x869   :  { %v1681_v13 = vmul.f32 %v2102_v11, %v2865_v7 }
 0x86a   :  { %v2104_v15 = vpop.eup %2103 }
 0x86b   :  { %v1683_v14 = vadd.f32 %v1682_v54, %v1681_v13 }
 0x86d   :  { %1687 = vst [vmem:[#allocation11] sm:$0x3] %v1683_v14  ;;  %2105 = vtanh.f32 %v1683_v14 }
 0x877   :  { %v2106_v16 = vpop.eup %2105 }
 0x878   :  { %v1685_v18 = vmul.f32 %v2106_v16, %v2104_v15 }
 0x87a   :  { %v1695_v19 = vmul.f32 %v1902_v17, %v1685_v18  ;;  %1686 = vst [vmem:[#allocation10] sm:$0x3] %v1685_v18 }
 0x87c   :  { %v1697_v20 = vsel %vm1696_vm1, %v1695_v19, 0.0 }
 0x87d   :  { %1698 = vadd.xlane.f32.xlu0 %v1697_v20 }
 0x87e   :  { %2210 = shalt.err (!%p2207_p11)
}
 0x87f   :  { %s2211_s2 = scalar_lea.hbm %s2919_s8, 32 }
 0x880   :  { %p2212_p12 = scmp.ne.s32.totalorder %s2919_s8, %s2211_s2  ;;  %p2215_p13 = scmp.lt.u32.totalorder %s2211_s2, %s2919_s8 }
 0x882   :  { %p2217_p0 = pnand %p2215_p13, %p2212_p12 }
 0x884   :  { %2220 = shalt.err (!%p2217_p0)
}
 0x885   :  { %1727 = dma.vmem_to_hbm [thread:$0]  %s1725_s6, 32, %s2919_s8, [#allocation5]  }
 0x886   :  { %s2221_s23 = scalar_lea.vmem %s1735_s16, 32  ;;  %p2226_p2 = scmp.lt.s32.totalorder %s1735_s16, %s1735_s16 }
 0x887   :  { %p2222_p1 = scmp.ne.s32.totalorder %s1735_s16, %s2221_s23  ;;  %p2227_p3 = scmp.lt.s32.totalorder %s2221_s23, %s2221_s23 }
 0x889   :  { %p2228_p4 = por %p2227_p3, %p2226_p2 }
 0x88b   :  { %p2229_p5 = pnand %p2228_p4, %p2222_p1 }
 0x88d   :  { %2232 = shalt.err (!%p2229_p5)
}
 0x88e   :  { %s2233_s26 = scalar_lea.hbm %s2920_s9, 32 }
 0x88f   :  { %p2234_p6 = scmp.ne.s32.totalorder %s2920_s9, %s2233_s26  ;;  %p2237_p7 = scmp.lt.u32.totalorder %s2233_s26, %s2920_s9 }
 0x891   :  { %p2239_p8 = pnand %p2237_p7, %p2234_p6 }
 0x893   :  { %2242 = shalt.err (!%p2239_p8)
}
 0x894   :  { %1737 = dma.vmem_to_hbm [thread:$0]  %s1735_s16, 32, %s2920_s9, [#allocation12]   ;;  %v1903_v21 = vld [vmem:[#allocation2] ss:$0 sm:$0xff]  ;;  %vm1714_vm2 = vcmask 1024  }
 0x90a   :  { %v1699_v22 = vpop.xlane.xlu0 %1698 }
 0x90b   :  { %v1707_v23 = vadd.f32 %v1903_v21, %v1699_v22 }
 0x90d   :  { %v1904_v24 = vmul.f32 -1.442695, %v1707_v23 }
 0x90f   :  { %2107 = vpow2.f32 %v1904_v24 }
 0x919   :  { %v2108_v44 = vpop.eup %2107 }
 0x91a   :  { %v1711_v37 = vadd.f32 1.0, %v2108_v44 }
 0x91c   :  { %2109 = vrcp.f32 %v1711_v37 }
 0x926   :  { %v2110_v0 = vpop.eup %2109 }
 0x927   :  { %1715 = vst.msk [vmem:[%s2918_s7] sm:$0x3] %vm1714_vm2, %v2110_v0 }
 0x928   :  { %2249 = dma.done.wait [#allocation5], 32  }
 0x929   :  { %2250 = vsyncadd [#allocation5], 4294967264 }
 0x92a   :  { %2251 = dma.done.wait [#allocation12], 32  }
 0x92b   :  { %2252 = vsyncadd [#allocation12], 4294967264 }
 0x92c   :  { %1746 = vsyncpa [#allocation4], 1 }
 0x92d   :  { %1747 = vsyncpa [#allocation9], 1 }
 0x92e   :  { %1748 = vsyncpa [#allocation5], 1 }
 0x92f   :  { %1749 = vsyncpa [#allocation12], 1 }
 0x930   :  { %1750 = vsyncpa [#allocation6], 1 }

</bundles_post_ra>
